<compile_context>
chip_gen: v7x
topology: tpu7x:2x2x1
jax: 0.10.0
libtpu: 0.0.40
codegen_flags: <defaults>
</compile_context>

<pallas_src>
import functools

import jax
import jax.numpy as jnp
from jax.experimental import pallas as pl
from jax.experimental.pallas import tpu as pltpu

_HIGH = jax.lax.Precision.HIGHEST
_EPS = 1e-12  # F.normalize eps


# ----------------------------------------------------------------------------
# Kernel
# ----------------------------------------------------------------------------
def color_eh_kernel(fea_ref, g_ref, ninei_ref,
                    w11_ref, b11_ref, w21_ref, b21_ref,
                    w31_ref, b31_ref, w41_ref, b41_ref,
                    w22_ref, b22_ref, w23_ref, b23_ref,
                    out_ref, *, M):
    N, F = fea_ref.shape
    fea = fea_ref[...]                                            # (N, 9)

    # Preprocessing: cols 3:6 /= 255, cols 0:3 and 6:9 L2-normalised over N.
    sumsq = jnp.sum(fea * fea, axis=0, keepdims=True)             # (1, F)
    denom = jnp.maximum(jnp.sqrt(sumsq), _EPS)
    col = jax.lax.broadcasted_iota(jnp.int32, (1, F), 1)
    is_color = jnp.logical_and(col >= 3, col < 6)
    scale = jnp.where(is_color, jnp.full_like(denom, 1.0 / 255.0), 1.0 / denom)
    fea_p = fea * scale                                           # (N, F)

    def dot(a, b):
        return jnp.dot(a, b, preferred_element_type=jnp.float32)

    def relu(x):
        return jnp.maximum(x, 0.0)

    # Point-wise MLP chain (each block folded to a single matmul + bias).
    fea1 = relu(dot(fea_p, w11_ref[...]) + b11_ref[...])          # (N, 18)
    fea2 = relu(dot(fea1, w21_ref[...]) + b21_ref[...])           # (N, 54)
    fea3 = relu(dot(fea2, w31_ref[...]) + b31_ref[...])           # (N, 18)
    fea4 = relu(dot(fea3, w41_ref[...]) + b41_ref[...])           # (N, 6)

    # Neighbour branch:
    #   fc22 on all M*N neighbour-difference rows in one matmul,
    #   gather fea2[link] as a one-hot MXU matmul,
    #   lane-concat the M blocks -> one (N, M*54) @ (M*54, 54) for fc23.
    a_all = relu(dot(ninei_ref[...], w22_ref[...]) + b22_ref[...])  # (M*N, 54)
    gath = dot(g_ref[...], fea2)                                    # (M*N, 54)
    prod = gath * a_all
    prod_wide = jnp.concatenate(
        [prod[m * N:(m + 1) * N, :] for m in range(M)], axis=-1)    # (N, M*54)
    fea2_1 = relu(dot(prod_wide, w23_ref[...]) + b23_ref[...])      # (N, 54)

    # Single lane-dense output slab: [fea4 | fea3 | fea2_1 | fea1 | fea[:, :6]]
    out_ref[...] = jnp.concatenate(
        [fea4, fea3, fea2_1, fea1, fea_p[:, :6]], axis=-1)          # (N, 102)


# ----------------------------------------------------------------------------
# Parameters
# ----------------------------------------------------------------------------
def init_params(key):
    """PyTorch-Linear-style uniform init; weights stored as (in, out)."""
    def linear(k, fan_in, fan_out):
        kw, kb = jax.random.split(k)
        bound = float(1.0 / (fan_in ** 0.5))
        w = jax.random.uniform(kw, (fan_in, fan_out), jnp.float32, -bound, bound)
        b = jax.random.uniform(kb, (1, fan_out), jnp.float32, -bound, bound)
        return w, b

    def fc_block(k, cin, cout):
        k1, k2, k3 = jax.random.split(k, 3)
        return (linear(k1, cin, cout), linear(k2, cout, cout), linear(k3, cout, cout))

    ks = jax.random.split(key, 6)
    return {
        "fc11": fc_block(ks[0], 6, 18),
        "fc21": fc_block(ks[1], 18, 54),
        "fc31": fc_block(ks[2], 54, 18),
        "fc41": fc_block(ks[3], 18, 6),
        "fc22": fc_block(ks[4], 6, 54),
        "fc23": fc_block(ks[5], 486, 54),
    }


def _fold_fc(layers):
    """Fold Linear->Linear->Linear (no interleaved nonlinearity) into (W, b)."""
    (w1, b1), (w2, b2), (w3, b3) = layers
    w = jnp.dot(jnp.dot(w1, w2, precision=_HIGH), w3, precision=_HIGH)
    b = jnp.dot(jnp.dot(b1, w2, precision=_HIGH) + b2, w3, precision=_HIGH) + b3
    return w, b


# ----------------------------------------------------------------------------
# Wrapper
# ----------------------------------------------------------------------------
@jax.jit
def color_eh(color_point_fea, color_point_link, params):
    """color_point_fea: (N, 9) f32, color_point_link: (N, M) int32."""
    N, F = color_point_fea.shape
    M = color_point_link.shape[1]

    # Link fix-up: a zero entry means "no neighbour" -> point at itself.
    row = jnp.arange(N, dtype=color_point_link.dtype)[:, None]
    link = jnp.where(color_point_link == 0, row, color_point_link)
    lf = link.T.reshape(-1)                                    # m-major, (M*N,)

    # One-hot gather matrix: row m*N+n selects fea2[link[n, m]] inside kernel.
    gmat = jax.nn.one_hot(lf, N, dtype=jnp.float32)            # (M*N, N)

    # Neighbour differences on the RAW features (the PyTorch forward builds
    # ninei before the in-place normalisation), keeping cols [0,1,2,6,7,8].
    nb = jnp.take(color_point_fea, lf, axis=0)                 # (M*N, F)
    base = jnp.tile(color_point_fea, (M, 1))                   # (M*N, F)
    diff = nb - base
    ninei = jnp.concatenate([diff[:, :3], diff[:, 6:9]], axis=-1)   # (M*N, 6)

    # Fold each 3-Linear chain into one matmul; pad fc11's input dim 6 -> 9 so
    # the kernel can feed the whole preprocessed (N, 9) slab.
    w11, b11 = _fold_fc(params["fc11"])
    w11 = jnp.zeros((F, w11.shape[1]), jnp.float32).at[:6, :].set(w11)
    w21, b21 = _fold_fc(params["fc21"])
    w31, b31 = _fold_fc(params["fc31"])
    w41, b41 = _fold_fc(params["fc41"])
    w22, b22 = _fold_fc(params["fc22"])
    w23, b23 = _fold_fc(params["fc23"])                        # (486, 54)

    out_dim = w41.shape[1] + w31.shape[1] + w23.shape[1] + w11.shape[1] + 6

    inputs = (color_point_fea, gmat, ninei,
              w11, b11, w21, b21, w31, b31, w41, b41, w22, b22, w23, b23)

    return pl.pallas_call(
        functools.partial(color_eh_kernel, M=M),
        out_shape=jax.ShapeDtypeStruct((N, out_dim), jnp.float32),
        in_specs=[pl.BlockSpec(memory_space=pltpu.MemorySpace.VMEM)] * len(inputs),
        out_specs=pl.BlockSpec(memory_space=pltpu.MemorySpace.VMEM),
    )(*inputs)


# ----------------------------------------------------------------------------
# Pure-JAX reference mirroring the PyTorch forward (unfused), for validation.
# ----------------------------------------------------------------------------
def color_eh_reference(color_point_fea, color_point_link, params):
    fea = color_point_fea
    link = color_point_link
    N, F = fea.shape
    M = link.shape[1]

    row = jnp.arange(N, dtype=link.dtype)[:, None]
    link = jnp.where(link == 0, row, link)
    lf = link.reshape(-1)                                      # n-major (PyTorch)

    ninei = jnp.take(fea, lf, axis=0).reshape(N, M, F) - fea[:, None, :]

    def l2norm_cols(x):
        n = jnp.sqrt(jnp.sum(x * x, axis=0, keepdims=True))
        return x / jnp.maximum(n, _EPS)

    fea = jnp.concatenate(
        [l2norm_cols(fea[:, :3]), fea[:, 3:6] / 255.0, l2norm_cols(fea[:, 6:])],
        axis=-1)
    ninei = jnp.concatenate([ninei[:, :, :3], ninei[:, :, 6:9]], axis=-1)

    def fc(x, layers):
        for w, b in layers:
            x = jnp.dot(x, w, precision=_HIGH) + b
        return jnp.maximum(x, 0.0)

    fea1 = fc(fea[:, :6], params["fc11"])
    fea2 = fc(fea1, params["fc21"])
    fea3 = fc(fea2, params["fc31"])
    fea4 = fc(fea3, params["fc41"])

    fea2_1 = jnp.take(fea2, lf, axis=0).reshape(N, M, -1)
    fea2_1 = fea2_1 * fc(ninei, params["fc22"])
    fea2_1 = fc(fea2_1.reshape(N, -1), params["fc23"])

    return jnp.concatenate([fea4, fea3, fea2_1, fea1, fea[:, :6]], axis=-1)


# ----------------------------------------------------------------------------
if __name__ == "__main__":
    N, M, F = 64, 9, 9          # points, neighbours (486 = 9*54), raw features

    key = jax.random.PRNGKey(0)
    k_xyz, k_rgb, k_ext, k_link, k_par = jax.random.split(key, 5)
    coords = jax.random.normal(k_xyz, (N, 3), jnp.float32) * 5.0
    colors = jax.random.uniform(k_rgb, (N, 3), jnp.float32, 0.0, 255.0)
    extra = jax.random.normal(k_ext, (N, 3), jnp.float32)
    color_point_fea = jnp.concatenate([coords, colors, extra], axis=-1)   # (N, 9)
    color_point_link = jax.random.randint(k_link, (N, M), 0, N, dtype=jnp.int32)
    params = init_params(k_par)

    out = color_eh(color_point_fea, color_point_link, params)
    jax.block_until_ready(out)

    ref = color_eh_reference(color_point_fea, color_point_link, params)
    assert out.shape == (N, 102)
    assert jnp.allclose(out, ref, rtol=5e-3, atol=5e-3), \
        float(jnp.max(jnp.abs(out - ref)))

    print("KERNEL_OK")
</pallas_src>

<mosaic_0001>
module attributes {stable_mosaic.version = 11 : i64} {
  func.func @color_eh_kernel(%arg0: memref<64x9xf32, #tpu.memory_space<vmem>>, %arg1: memref<576x64xf32, #tpu.memory_space<vmem>>, %arg2: memref<576x6xf32, #tpu.memory_space<vmem>>, %arg3: memref<9x18xf32, #tpu.memory_space<vmem>>, %arg4: memref<1x18xf32, #tpu.memory_space<vmem>>, %arg5: memref<18x54xf32, #tpu.memory_space<vmem>>, %arg6: memref<1x54xf32, #tpu.memory_space<vmem>>, %arg7: memref<54x18xf32, #tpu.memory_space<vmem>>, %arg8: memref<1x18xf32, #tpu.memory_space<vmem>>, %arg9: memref<18x6xf32, #tpu.memory_space<vmem>>, %arg10: memref<1x6xf32, #tpu.memory_space<vmem>>, %arg11: memref<6x54xf32, #tpu.memory_space<vmem>>, %arg12: memref<1x54xf32, #tpu.memory_space<vmem>>, %arg13: memref<486x54xf32, #tpu.memory_space<vmem>>, %arg14: memref<1x54xf32, #tpu.memory_space<vmem>>, %arg15: memref<64x102xf32, #tpu.memory_space<vmem>>) attributes {dimension_semantics = [], scalar_prefetch = 0 : i64, scratch_operands = 0 : i64, tpu.core_type = #tpu.core_type<tc>} {
    %c0 = arith.constant 0 : index
    %c0_0 = arith.constant 0 : index
    %0 = vector.load %arg0[%c0, %c0_0] : memref<64x9xf32, #tpu.memory_space<vmem>>, vector<64x9xf32>
    %1 = arith.mulf %0, %0 : vector<64x9xf32>
    %cst = arith.constant dense<0.000000e+00> : vector<9xf32>
    %2 = vector.multi_reduction <add>, %1, %cst [0] : vector<64x9xf32> to vector<9xf32>
    %3 = vector.shape_cast %2 : vector<9xf32> to vector<1x9xf32>
    %4 = math.sqrt %3 : vector<1x9xf32>
    %cst_1 = arith.constant 9.99999996E-13 : f32
    %5 = vector.broadcast %cst_1 : f32 to vector<1x9xf32>
    %6 = arith.maximumf %4, %5 : vector<1x9xf32>
    %7 = tpu.iota {dimensions = array<i32: 1>} : vector<1x9xi32>
    %c3_i32 = arith.constant 3 : i32
    %8 = vector.broadcast %c3_i32 : i32 to vector<1x9xi32>
    %9 = arith.cmpi sge, %7, %8 : vector<1x9xi32>
    %c6_i32 = arith.constant 6 : i32
    %10 = vector.broadcast %c6_i32 : i32 to vector<1x9xi32>
    %11 = arith.cmpi slt, %7, %10 : vector<1x9xi32>
    %12 = arith.andi %9, %11 : vector<1x9xi1>
    %cst_2 = arith.constant 0.00392156886 : f32
    %13 = vector.broadcast %cst_2 : f32 to vector<1x9xf32>
    %cst_3 = arith.constant 1.000000e+00 : f32
    %14 = vector.broadcast %cst_3 : f32 to vector<1x9xf32>
    %15 = arith.divf %14, %6 : vector<1x9xf32>
    %16 = arith.select %12, %13, %15 : vector<1x9xi1>, vector<1x9xf32>
    %17 = vector.broadcast %16 : vector<1x9xf32> to vector<64x9xf32>
    %18 = arith.mulf %0, %17 : vector<64x9xf32>
    %c0_4 = arith.constant 0 : index
    %c0_5 = arith.constant 0 : index
    %19 = vector.load %arg3[%c0_4, %c0_5] : memref<9x18xf32, #tpu.memory_space<vmem>>, vector<9x18xf32>
    %cst_6 = arith.constant dense<0.000000e+00> : vector<64x18xf32>
    %20 = tpu.matmul %18, %19, %cst_6 {dimension_numbers = #tpu.dot_dimension_numbers<[1], [0], [0], [1], [0, 0, 1, 1], [], []>} : vector<64x9xf32>, vector<9x18xf32>, vector<64x18xf32> -> vector<64x18xf32>
    %c0_7 = arith.constant 0 : index
    %c0_8 = arith.constant 0 : index
    %21 = vector.load %arg4[%c0_7, %c0_8] : memref<1x18xf32, #tpu.memory_space<vmem>>, vector<1x18xf32>
    %22 = vector.broadcast %21 : vector<1x18xf32> to vector<64x18xf32>
    %23 = arith.addf %20, %22 : vector<64x18xf32>
    %cst_9 = arith.constant 0.000000e+00 : f32
    %24 = vector.broadcast %cst_9 : f32 to vector<64x18xf32>
    %25 = arith.maximumf %23, %24 : vector<64x18xf32>
    %c0_10 = arith.constant 0 : index
    %c0_11 = arith.constant 0 : index
    %26 = vector.load %arg5[%c0_10, %c0_11] : memref<18x54xf32, #tpu.memory_space<vmem>>, vector<18x54xf32>
    %cst_12 = arith.constant dense<0.000000e+00> : vector<64x54xf32>
    %27 = tpu.matmul %25, %26, %cst_12 {dimension_numbers = #tpu.dot_dimension_numbers<[1], [0], [0], [1], [0, 0, 1, 1], [], []>} : vector<64x18xf32>, vector<18x54xf32>, vector<64x54xf32> -> vector<64x54xf32>
    %c0_13 = arith.constant 0 : index
    %c0_14 = arith.constant 0 : index
    %28 = vector.load %arg6[%c0_13, %c0_14] : memref<1x54xf32, #tpu.memory_space<vmem>>, vector<1x54xf32>
    %29 = vector.broadcast %28 : vector<1x54xf32> to vector<64x54xf32>
    %30 = arith.addf %27, %29 : vector<64x54xf32>
    %cst_15 = arith.constant 0.000000e+00 : f32
    %31 = vector.broadcast %cst_15 : f32 to vector<64x54xf32>
    %32 = arith.maximumf %30, %31 : vector<64x54xf32>
    %c0_16 = arith.constant 0 : index
    %c0_17 = arith.constant 0 : index
    %33 = vector.load %arg7[%c0_16, %c0_17] : memref<54x18xf32, #tpu.memory_space<vmem>>, vector<54x18xf32>
    %cst_18 = arith.constant dense<0.000000e+00> : vector<64x18xf32>
    %34 = tpu.matmul %32, %33, %cst_18 {dimension_numbers = #tpu.dot_dimension_numbers<[1], [0], [0], [1], [0, 0, 1, 1], [], []>} : vector<64x54xf32>, vector<54x18xf32>, vector<64x18xf32> -> vector<64x18xf32>
    %c0_19 = arith.constant 0 : index
    %c0_20 = arith.constant 0 : index
    %35 = vector.load %arg8[%c0_19, %c0_20] : memref<1x18xf32, #tpu.memory_space<vmem>>, vector<1x18xf32>
    %36 = vector.broadcast %35 : vector<1x18xf32> to vector<64x18xf32>
    %37 = arith.addf %34, %36 : vector<64x18xf32>
    %cst_21 = arith.constant 0.000000e+00 : f32
    %38 = vector.broadcast %cst_21 : f32 to vector<64x18xf32>
    %39 = arith.maximumf %37, %38 : vector<64x18xf32>
    %c0_22 = arith.constant 0 : index
    %c0_23 = arith.constant 0 : index
    %40 = vector.load %arg9[%c0_22, %c0_23] : memref<18x6xf32, #tpu.memory_space<vmem>>, vector<18x6xf32>
    %cst_24 = arith.constant dense<0.000000e+00> : vector<64x6xf32>
    %41 = tpu.matmul %39, %40, %cst_24 {dimension_numbers = #tpu.dot_dimension_numbers<[1], [0], [0], [1], [0, 0, 1, 1], [], []>} : vector<64x18xf32>, vector<18x6xf32>, vector<64x6xf32> -> vector<64x6xf32>
    %c0_25 = arith.constant 0 : index
    %c0_26 = arith.constant 0 : index
    %42 = vector.load %arg10[%c0_25, %c0_26] : memref<1x6xf32, #tpu.memory_space<vmem>>, vector<1x6xf32>
    %43 = vector.broadcast %42 : vector<1x6xf32> to vector<64x6xf32>
    %44 = arith.addf %41, %43 : vector<64x6xf32>
    %cst_27 = arith.constant 0.000000e+00 : f32
    %45 = vector.broadcast %cst_27 : f32 to vector<64x6xf32>
    %46 = arith.maximumf %44, %45 : vector<64x6xf32>
    %c0_28 = arith.constant 0 : index
    %c0_29 = arith.constant 0 : index
    %47 = vector.load %arg2[%c0_28, %c0_29] : memref<576x6xf32, #tpu.memory_space<vmem>>, vector<576x6xf32>
    %c0_30 = arith.constant 0 : index
    %c0_31 = arith.constant 0 : index
    %48 = vector.load %arg11[%c0_30, %c0_31] : memref<6x54xf32, #tpu.memory_space<vmem>>, vector<6x54xf32>
    %cst_32 = arith.constant dense<0.000000e+00> : vector<576x54xf32>
    %49 = tpu.matmul %47, %48, %cst_32 {dimension_numbers = #tpu.dot_dimension_numbers<[1], [0], [0], [1], [0, 0, 1, 1], [], []>} : vector<576x6xf32>, vector<6x54xf32>, vector<576x54xf32> -> vector<576x54xf32>
    %c0_33 = arith.constant 0 : index
    %c0_34 = arith.constant 0 : index
    %50 = vector.load %arg12[%c0_33, %c0_34] : memref<1x54xf32, #tpu.memory_space<vmem>>, vector<1x54xf32>
    %51 = vector.broadcast %50 : vector<1x54xf32> to vector<576x54xf32>
    %52 = arith.addf %49, %51 : vector<576x54xf32>
    %cst_35 = arith.constant 0.000000e+00 : f32
    %53 = vector.broadcast %cst_35 : f32 to vector<576x54xf32>
    %54 = arith.maximumf %52, %53 : vector<576x54xf32>
    %c0_36 = arith.constant 0 : index
    %c0_37 = arith.constant 0 : index
    %55 = vector.load %arg1[%c0_36, %c0_37] : memref<576x64xf32, #tpu.memory_space<vmem>>, vector<576x64xf32>
    %cst_38 = arith.constant dense<0.000000e+00> : vector<576x54xf32>
    %56 = tpu.matmul %55, %32, %cst_38 {dimension_numbers = #tpu.dot_dimension_numbers<[1], [0], [0], [1], [0, 0, 1, 1], [], []>} : vector<576x64xf32>, vector<64x54xf32>, vector<576x54xf32> -> vector<576x54xf32>
    %57 = arith.mulf %56, %54 : vector<576x54xf32>
    %58 = vector.extract_strided_slice %57 {offsets = [0, 0], sizes = [64, 54], strides = [1, 1]} : vector<576x54xf32> to vector<64x54xf32>
    %59 = vector.extract_strided_slice %57 {offsets = [64, 0], sizes = [64, 54], strides = [1, 1]} : vector<576x54xf32> to vector<64x54xf32>
    %60 = vector.extract_strided_slice %57 {offsets = [128, 0], sizes = [64, 54], strides = [1, 1]} : vector<576x54xf32> to vector<64x54xf32>
    %61 = vector.extract_strided_slice %57 {offsets = [192, 0], sizes = [64, 54], strides = [1, 1]} : vector<576x54xf32> to vector<64x54xf32>
    %62 = vector.extract_strided_slice %57 {offsets = [256, 0], sizes = [64, 54], strides = [1, 1]} : vector<576x54xf32> to vector<64x54xf32>
    %63 = vector.extract_strided_slice %57 {offsets = [320, 0], sizes = [64, 54], strides = [1, 1]} : vector<576x54xf32> to vector<64x54xf32>
    %64 = vector.extract_strided_slice %57 {offsets = [384, 0], sizes = [64, 54], strides = [1, 1]} : vector<576x54xf32> to vector<64x54xf32>
    %65 = vector.extract_strided_slice %57 {offsets = [448, 0], sizes = [64, 54], strides = [1, 1]} : vector<576x54xf32> to vector<64x54xf32>
    %66 = vector.extract_strided_slice %57 {offsets = [512, 0], sizes = [64, 54], strides = [1, 1]} : vector<576x54xf32> to vector<64x54xf32>
    %67 = tpu.concatenate %58, %59, %60, %61, %62, %63, %64, %65, %66 in 1 : vector<64x54xf32>, vector<64x54xf32>, vector<64x54xf32>, vector<64x54xf32>, vector<64x54xf32>, vector<64x54xf32>, vector<64x54xf32>, vector<64x54xf32>, vector<64x54xf32> -> vector<64x486xf32>
    %c0_39 = arith.constant 0 : index
    %c0_40 = arith.constant 0 : index
    %68 = vector.load %arg13[%c0_39, %c0_40] : memref<486x54xf32, #tpu.memory_space<vmem>>, vector<486x54xf32>
    %cst_41 = arith.constant dense<0.000000e+00> : vector<64x54xf32>
    %69 = tpu.matmul %67, %68, %cst_41 {dimension_numbers = #tpu.dot_dimension_numbers<[1], [0], [0], [1], [0, 0, 1, 1], [], []>} : vector<64x486xf32>, vector<486x54xf32>, vector<64x54xf32> -> vector<64x54xf32>
    %c0_42 = arith.constant 0 : index
    %c0_43 = arith.constant 0 : index
    %70 = vector.load %arg14[%c0_42, %c0_43] : memref<1x54xf32, #tpu.memory_space<vmem>>, vector<1x54xf32>
    %71 = vector.broadcast %70 : vector<1x54xf32> to vector<64x54xf32>
    %72 = arith.addf %69, %71 : vector<64x54xf32>
    %cst_44 = arith.constant 0.000000e+00 : f32
    %73 = vector.broadcast %cst_44 : f32 to vector<64x54xf32>
    %74 = arith.maximumf %72, %73 : vector<64x54xf32>
    %75 = vector.extract_strided_slice %18 {offsets = [0, 0], sizes = [64, 6], strides = [1, 1]} : vector<64x9xf32> to vector<64x6xf32>
    %76 = tpu.concatenate %46, %39, %74, %25, %75 in 1 : vector<64x6xf32>, vector<64x18xf32>, vector<64x54xf32>, vector<64x18xf32>, vector<64x6xf32> -> vector<64x102xf32>
    %c0_45 = arith.constant 0 : index
    %c0_46 = arith.constant 0 : index
    %77 = vector.load %arg15[%c0_45, %c0_46] : memref<64x102xf32, #tpu.memory_space<vmem>>, vector<64x102xf32>
    tpu.vector_store %arg15[%c0_45, %c0_46], %76 {strides = array<i32>} : memref<64x102xf32, #tpu.memory_space<vmem>>, vector<64x102xf32>,
    return
  }
}

</mosaic_0001>

<bundles_post_ra>
// kernel: eq.1
= control target key start
LH: loop header
LB: loop body
LE: loop exit
PB: predicated region body
PF: predicated region fallthrough
CT: control target
= control target key end

     0   :  { %vm3_vm0 = vcmask 523264   ;;  %s13_s11 = smov 64   ;;  %vm9_vm1 = vcmask 1048064   ;;  %s36_s0 = inlined_call_operand.vmem [shape: s32[9,64], index: 0, kind: input, shape index: {}]   ;;  %s37_s1 = inlined_call_operand.vmem [shape: s32[576], index: 1, kind: output, shape index: {}]  }
   0x1   :  { %v2_v0 = vld [vmem:[%s36_s0] ss:$2 sm:$0x1f]   ;;  %v11_v1 = vld [vmem:[%s36_s0 + $0x1] ss:$2 sm:$0xf]  }
   0x2   :  { %4 = vst.msk [vmem:[%s37_s1] sm:$0x1f] %vm3_vm0, %v2_v0   ;;  %7 = vrot.lane.b32.xlu0 %v11_v1, %s13_s11 }
  0x74   :  { %v8_v2 = vpop.permute.xlu0 %7  }
  0x75   :  { %10 = vst.msk [vmem:[%s37_s1] sm:$0xf] %vm9_vm1, %v8_v2  }

// kernel: color_eh.1
= control target key start
LH: loop header
LB: loop body
LE: loop exit
PB: predicated region body
PF: predicated region fallthrough
CT: control target
= control target key end

     0   :  { %vm146_vm0 = vcmask 1040384   ;;  %vm4154_vm1 = vmmov 1   ;;  %vm67_vm3 = vcmask 72704   ;;  %s5971_s0 = inlined_call_operand.vmem [shape: f32[64,9], index: 0, kind: input, shape index: {}]   ;;  %s5972_s1 = inlined_call_operand.vmem [shape: f32[576,64], index: 1, kind: input, shape index: {}]   ;;  %s5973_s2 = inlined_call_operand.vmem [shape: f32[576,6], index: 2, kind: input, shape index: {}]   ;;  %s5974_s3 = inlined_call_operand.vmem [shape: f32[9,18], index: 3, kind: input, shape index: {}]   ;;  %s5975_s4 = inlined_call_operand.vmem [shape: f32[1,18], index: 4, kind: input, shape index: {}]   ;;  %s5976_s5 = inlined_call_operand.vmem [shape: f32[18,54], index: 5, kind: input, shape index: {}]   ;;  %s5977_s6 = inlined_call_operand.vmem [shape: f32[1,54], index: 6, kind: input, shape index: {}]   ;;  %s5978_s7 = inlined_call_operand.vmem [shape: f32[54,18], index: 7, kind: input, shape index: {}]   ;;  %s5979_s8 = inlined_call_operand.vmem [shape: f32[1,18], index: 8, kind: input, shape index: {}]   ;;  %s5980_s9 = inlined_call_operand.vmem [shape: f32[18,6], index: 9, kind: input, shape index: {}]   ;;  %s5981_s10 = inlined_call_operand.vmem [shape: f32[1,6], index: 10, kind: input, shape index: {}]   ;;  %s5982_s11 = inlined_call_operand.vmem [shape: f32[6,54], index: 11, kind: input, shape index: {}]   ;;  %s5983_s12 = inlined_call_operand.vmem [shape: f32[1,54], index: 12, kind: input, shape index: {}]   ;;  %s5984_s13 = inlined_call_operand.vmem [shape: f32[486,54], index: 13, kind: input, shape index: {}]   ;;  %s5985_s14 = inlined_call_operand.vmem [shape: f32[1,54], index: 14, kind: input, shape index: {}]   ;;  %s5986_s15 = inlined_call_operand.hbm [shape: f32[64,102], index: 15, kind: output, shape index: {}]  }
   0x1   :  { %v113_v0 = vld [vmem:[%s5974_s3] sm:$0xff]  ;;  %v114_v1 = vld [vmem:[%s5974_s3 + $0x8] sm:$0x1]  ;;  %vm3873_vm2 = vmpackc.low %vm146_vm0, %vm4154_vm1 }
   0x2   :  { %v51_v2 = vld [vmem:[%s5971_s0] sm:$0xff]  ;;  %v3872_v3 = vpack.c.bf16 %v114_v1, %v113_v0  ;;  %v52_v4 = vld [vmem:[%s5971_s0 + $0x8] sm:$0xff]  ;;  %v53_v5 = vld [vmem:[%s5971_s0 + $0x10] sm:$0xff] }
   0x3   :  { %v59_v6 = vmul.f32 %v51_v2, %v51_v2  ;;  %v54_v7 = vld [vmem:[%s5971_s0 + $0x18] sm:$0xff]  ;;  %v55_v8 = vld [vmem:[%s5971_s0 + $0x20] sm:$0xff]  ;;  %v60_v9 = vmul.f32 %v52_v4, %v52_v4  ;;  %v61_v10 = vmul.f32 %v53_v5, %v53_v5  ;;  %v56_v11 = vld [vmem:[%s5971_s0 + $0x28] sm:$0xff] }
   0x4   :  { %3874 = vmatprep.subr.msk.bf16.mxu0 %vm3873_vm2, %v3872_v3  ;;  %v62_v12 = vmul.f32 %v54_v7, %v54_v7 }
   0x5   :  { %v68_v13 = vsel %vm67_vm3, %v59_v6, 0.0 }
   0x6   :  { %20 = vsyncpa [#allocation3], 0  ;;  %3877 = vmatpush3.bf16.msk.msra.mxu0 %vm3873_vm2, %v3872_v3  ;;  %v63_v14 = vmul.f32 %v55_v8, %v55_v8  ;;  %v69_v15 = vsel %vm67_vm3, %v60_v9, 0.0  ;;  %v71_v16 = vsel %vm67_vm3, %v61_v10, 0.0  ;;  %v57_v17 = vld [vmem:[%s5971_s0 + $0x30] sm:$0xff]  ;;  %v64_v19 = vmul.f32 %v56_v11, %v56_v11  ;;  %v58_v21 = vld [vmem:[%s5971_s0 + $0x38] sm:$0xff] }
   0x7   :  { %v70_v18 = vadd.f32 %v69_v15, %v68_v13  ;;  %v73_v20 = vsel %vm67_vm3, %v62_v12, 0.0  ;;  %v65_v23 = vmul.f32 %v57_v17, %v57_v17  ;;  %v66_v26 = vmul.f32 %v58_v21, %v58_v21  ;;  %v263_v58 = vld [vmem:[%s5976_s5] sm:$0xff]  ;;  %v264_v59 = vld [vmem:[%s5976_s5 + $0x8] sm:$0xff]  ;;  %v265_v61 = vld [vmem:[%s5976_s5 + $0x10] sm:$0x3]  ;;  %s4156_s28 = smov 54  }
   0x8   :  { %v75_v24 = vsel %vm67_vm3, %v63_v14, 0.0  ;;  %v77_v27 = vsel %vm67_vm3, %v64_v19, 0.0  ;;  %v97_v45 = vlaneseq  ;;  %v3878_v60 = vpack.c.bf16 %v264_v59, %v263_v58  ;;  %v415_v62 = vld [vmem:[%s5978_s7] sm:$0xff]  ;;  %v416_v63 = vld [vmem:[%s5978_s7 + $0x8] sm:$0xff]  ;;  %v417_v0 = vld [vmem:[%s5978_s7 + $0x10] sm:$0xff]  ;;  %s4157_s21 = smov 108  }
   0x9   :  { %v72_v22 = vadd.f32 %v71_v16, %v70_v18  ;;  %v79_v29 = vsel %vm67_vm3, %v65_v23, 0.0  ;;  %v81_v31 = vsel %vm67_vm3, %v66_v26, 0.0  ;;  %vm298_vm9 = vcmask 1041408   ;;  %s4158_s22 = smov 34   ;;  %s4160_s19 = smov 14  }
   0xa   :  { %v98_v47 = vand.u32 127, %v97_v45  ;;  %3879 = vmatprep.subr.bf16.mxu1 %v3878_v60  ;;  %v3882_v1 = vpack.c.bf16 %v416_v63, %v415_v62  ;;  %vm273_vm10 = vcmask 146432   ;;  %vm454_vm11 = vcmask 1045504   ;;  %s4163_s30 = smov 122  }
   0xb   :  { %v74_v25 = vadd.f32 %v73_v20, %v72_v22  ;;  %3881 = vmatpush3.bf16.msra.mxu1 %v3878_v60  ;;  %vm429_vm12 = vcmask 441344   ;;  %vm801_vm13 = vcmask 48128   ;;  %vm1590_vm14 = vcmask 523264  }
   0xc   :  { %vm99_vm6 = vcmp.ge.s32.totalorder %v98_v47, 3  ;;  %vm100_vm7 = vcmp.lt.s32.totalorder %v98_v47, 6  ;;  %3580 = vmatprep.subr.msk.mxu1 %vm298_vm9, %v265_v61  ;;  %3883 = vmatprep.subr.bf16.mxu0 %v3882_v1  ;;  %vm2577_vm15 = vcmask 277504   ;;  %vm2586_vm0 = vcmask 719872  }
   0xd   :  { %v76_v28 = vadd.f32 %v75_v24, %v74_v25  ;;  %vm101_vm8 = vmand %vm99_vm6, %vm100_vm7  ;;  %vm2568_vm1 = vcmask 883712   ;;  %vm2595_vm2 = vcmask 113664   ;;  %vm2613_vm6 = vcmask 998400  }
   0xe   :  { %vm3057_vm7 = vcmask 195584  }
   0xf   :  { %v78_v30 = vadd.f32 %v77_v27, %v76_v28  ;;  %3581 = vmatpush3.msk.msra.mxu1 %vm298_vm9, %v265_v61 }
  0x11   :  { %v80_v32 = vadd.f32 %v79_v29, %v78_v30 }
  0x13   :  { %v82_v33 = vadd.f32 %v81_v31, %v80_v32  ;;  %v571_v32 = vld [vmem:[%s5980_s9] sm:$0xff] }
  0x15   :  { %v83_v34 = vrot.slane %v82_v33, 4 }
  0x17   :  { %v84_v35 = vadd.f32 %v83_v34, %v82_v33  ;;  %v572_v33 = vld [vmem:[%s5980_s9 + $0x8] sm:$0xff] }
  0x18   :  { %v3894_v34 = vpack.c.bf16 %v572_v33, %v571_v32  ;;  %v726_v32 = vld [vmem:[%s5973_s2 + $0x28] sm:$0xff]  ;;  %v727_v33 = vld [vmem:[%s5973_s2 + $0x30] sm:$0xff] }
  0x19   :  { %v85_v36 = vrot.slane %v84_v35, 2 }
  0x1a   :  { %3895 = vmatprep.subr.bf16.mxu1 %v3894_v34 }
  0x1b   :  { %v86_v37 = vadd.f32 %v85_v36, %v84_v35  ;;  %v421_v35 = vld [vmem:[%s5978_s7 + $0x30] sm:$0x3f] }
  0x1c   :  { %v573_v36 = vld [vmem:[%s5980_s9 + $0x10] sm:$0x3]  ;;  %s4167_s9 = smov 96  }
  0x1d   :  { %v87_v38 = vrot.slane %v86_v37, 1 }
  0x1f   :  { %v88_v39 = vadd.f32 %v87_v38, %v86_v37  ;;  %v3118_v37 = vld [vmem:[%s5977_s6] ss:$0 sm:$0xff]  ;;  %s4165_s6 = smov 6  }
  0x21   :  { %4126 = vrsqrt.f32 %v88_v39  ;;  %vm91_vm4 = vcmp.eq.f32.partialorder %v88_v39, inf  ;;  %v94_v41 = vand.u32 2147483648, %v88_v39  ;;  %vm93_vm5 = vcmp.eq.f32.partialorder %v88_v39, 0.0 }
  0x2b   :  { %v4127_v40 = vpop.eup %4126 }
  0x2c   :  { %v90_v42 = vmul.f32 %v4127_v40, %v88_v39 }
  0x2e   :  { %v92_v43 = vsel %vm91_vm4, %v88_v39, %v90_v42  ;;  %vm2699_vm4 = vcmask 834560  }
  0x2f   :  { %v95_v44 = vsel %vm93_vm5, %v94_v41, %v92_v43  ;;  %vm2622_vm5 = vcmask 392192  }
  0x30   :  { %v96_v46 = vmax.f32 %v95_v44, 1e-12 }
  0x32   :  { %4128 = vrcp.f32 %v96_v46 }
  0x3c   :  { %v4129_v48 = vpop.eup %4128 }
  0x3d   :  { %v104_v49 = vsel %vm101_vm8, 0.003921569, %v4129_v48  ;;  %vm3066_vm8 = vcmask 637952  }
  0x3e   :  { %v4290_v50 = vmul.f32 %v104_v49, %v51_v2  ;;  %v4292_v51 = vmul.f32 %v104_v49, %v52_v4  ;;  %v4294_v52 = vmul.f32 %v104_v49, %v53_v5  ;;  %v4300_v53 = vmul.f32 %v104_v49, %v54_v7  ;;  %v418_v2 = vld [vmem:[%s5978_s7 + $0x18] sm:$0xff]  ;;  %v419_v4 = vld [vmem:[%s5978_s7 + $0x20] sm:$0xff]  ;;  %v420_v5 = vld [vmem:[%s5978_s7 + $0x28] sm:$0xff]  ;;  %s4166_s7 = smov 78  }
  0x3f   :  { %v4304_v54 = vmul.f32 %v104_v49, %v55_v8  ;;  %v4308_v55 = vmul.f32 %v104_v49, %v56_v11  ;;  %v4312_v56 = vmul.f32 %v104_v49, %v57_v17  ;;  %v4316_v57 = vmul.f32 %v104_v49, %v58_v21  ;;  %v3108_v7 = vld [vmem:[%s5975_s4] ss:$0 sm:$0xff] }
  0x40   :  { %6029 = vst [vmem:[#allocation5_spill] sm:$0xff] %v4290_v50  ;;  %6030 = vst [vmem:[#allocation6_spill] sm:$0xff] %v4292_v51  ;;  %3564 = vmatprep.mubr.msk.f32.mxu0 %vm67_vm3, %v4290_v50  ;;  %v3886_v3 = vpack.c.bf16 %v418_v2, %v417_v0  ;;  %v3890_v6 = vpack.c.bf16 %v420_v5, %v419_v4 }
  0x41   :  { %6031 = vst [vmem:[#allocation7_spill] sm:$0xff] %v4294_v52  ;;  %3565 = vmatmul.mubr.msk.f32.vlgmr.msra.gmra.mrb[0].mxu0 %vm67_vm3, %v4292_v51  ;;  %6032 = vst [vmem:[#allocation8_spill] sm:$0xff] %v4300_v53 }
  0x42   :  { %3567 = vmatprep.mubr.msk.f32.mxu0 %vm67_vm3, %v4294_v52  ;;  %6033 = vst [vmem:[#allocation9_spill] sm:$0xff] %v4304_v54  ;;  %6034 = vst [vmem:[#allocation10_spill] sm:$0xff] %v4308_v55  ;;  %3885 = vmatpush3.bf16.msra.mxu0 %v3882_v1 }
  0x43   :  { %6035 = vst [vmem:[#allocation11_spill] sm:$0xff] %v4312_v56  ;;  %6036 = vst [vmem:[#allocation12_spill] sm:$0xff] %v4316_v57  ;;  %3887 = vmatprep.subr.bf16.mxu0 %v3886_v3 }
  0x45   :  { %3568 = vmatmul.mubr.msk.f32.gmra.mrb[2].mxu0 %vm67_vm3, %v4300_v53 }
  0x46   :  { %3570 = vmatprep.mubr.msk.f32.mxu0 %vm67_vm3, %v4304_v54  ;;  %3889 = vmatpush3.bf16.msra.mxu0 %v3886_v3 }
  0x47   :  { %3891 = vmatprep.subr.bf16.mxu0 %v3890_v6 }
  0x49   :  { %3571 = vmatmul.mubr.msk.f32.gmra.mrb[4].mxu0 %vm67_vm3, %v4308_v55 }
  0x4a   :  { %3573 = vmatprep.mubr.msk.f32.mxu0 %vm67_vm3, %v4312_v56  ;;  %3893 = vmatpush3.bf16.msra.mxu0 %v3890_v6 }
  0x4b   :  { %3606 = vmatprep.subr.msk.mxu0 %vm454_vm11, %v421_v35 }
  0x4d   :  { %3574 = vmatmul.mubr.msk.f32.gmra.mrb[6].mxu0 %vm67_vm3, %v4316_v57  ;;  %vm2604_vm3 = vcmask 556032  }
  0x4e   :  { %3607 = vmatpush3.msk.msra.mxu0 %vm454_vm11, %v421_v35  ;;  %v729_v35 = vld [vmem:[%s5973_s2 + $0x40] sm:$0xff] }
 0x114   :  { %v3566_v8 = vpop.f32.mrb[0].mxu0 }
 0x115   :  { %v4354_v9 = vadd.f32 %v3566_v8, %v3108_v7  ;;  %v216_v10 = vpop.f32.mrb[1].mxu0 }
 0x116   :  { %v4356_v11 = vadd.f32 %v3108_v7, %v216_v10 }
 0x117   :  { %6037 = vst [vmem:[#allocation13_spill] sm:$0xff] %v4354_v9  ;;  %v5990_v14 = vmax.f32 %v4354_v9, 0.0 }
 0x118   :  { %6038 = vst [vmem:[#allocation14_spill] sm:$0xff] %v4356_v11  ;;  %v5998_v12 = vmax.f32 %v4356_v11, 0.0  ;;  %v3569_v13 = vpop.f32.mrb[2].mxu0  ;;  %v2632_v11 = vld [vmem:[%s5984_s13 + $0x8] sm:$0xff] }
 0x119   :  { %v4360_v15 = vadd.f32 %v3569_v13, %v3108_v7  ;;  %v226_v16 = vpop.f32.mrb[3].mxu0  ;;  %v793_v13 = vld [vmem:[%s5982_s11] sm:$0x3f] }
 0x11a   :  { %v4362_v17 = vadd.f32 %v3108_v7, %v226_v16  ;;  %3582 = vmatprep.mubr.msk.f32.mxu1 %vm273_vm10, %v5998_v12  ;;  %3638 = vmatprep.subr.msk.mxu0 %vm454_vm11, %v793_v13  ;;  %v721_v16 = vld [vmem:[%s5973_s2] sm:$0xff] }
 0x11b   :  { %6039 = vst [vmem:[#allocation15_spill] sm:$0xff] %v4360_v15  ;;  %3583 = vmatmul.mubr.msk.f32.vlgmr.msra.gmra.mrb[0].mxu1 %vm273_vm10, %v5990_v14  ;;  %v5989_v20 = vmax.f32 %v4360_v15, 0.0 }
 0x11c   :  { %6040 = vst [vmem:[#allocation16_spill] sm:$0xff] %v4362_v17  ;;  %v5996_v18 = vmax.f32 %v4362_v17, 0.0  ;;  %v3572_v19 = vpop.f32.mrb[4].mxu0  ;;  %3897 = vmatpush3.bf16.msra.mxu1 %v3894_v34  ;;  %v728_v34 = vld [vmem:[%s5973_s2 + $0x38] sm:$0xff]  ;;  %v2631_v17 = vld [vmem:[%s5984_s13] sm:$0xff] }
 0x11d   :  { %v4372_v21 = vadd.f32 %v3572_v19, %v3108_v7  ;;  %v236_v22 = vpop.f32.mrb[5].mxu0  ;;  %3624 = vmatprep.subr.msk.mxu1 %vm298_vm9, %v573_v36  ;;  %v722_v19 = vld [vmem:[%s5973_s2 + $0x8] sm:$0xff] }
 0x11e   :  { %v4374_v23 = vadd.f32 %v3108_v7, %v236_v22  ;;  %3585 = vmatprep.mubr.msk.f32.mxu1 %vm273_vm10, %v5996_v18  ;;  %v723_v22 = vld [vmem:[%s5973_s2 + $0x10] sm:$0xff] }
 0x11f   :  { %6041 = vst [vmem:[#allocation17_spill] sm:$0xff] %v4372_v21  ;;  %3586 = vmatmul.mubr.msk.f32.gmra.mrb[2].mxu1 %vm273_vm10, %v5989_v20  ;;  %v5988_v26 = vmax.f32 %v4372_v21, 0.0 }
 0x120   :  { %6042 = vst [vmem:[#allocation18_spill] sm:$0xff] %v4374_v23  ;;  %v5994_v24 = vmax.f32 %v4374_v23, 0.0  ;;  %v3575_v25 = vpop.f32.mrb[6].mxu0  ;;  %3625 = vmatpush3.msk.msra.mxu1 %vm298_vm9, %v573_v36  ;;  %v730_v36 = vld [vmem:[%s5973_s2 + $0x48] sm:$0xff]  ;;  %vm3075_vm9 = vcmask 785408  }
 0x121   :  { %v4384_v27 = vadd.f32 %v3575_v25, %v3108_v7  ;;  %v246_v28 = vpop.f32.mrb[7].mxu0  ;;  %v724_v25 = vld [vmem:[%s5973_s2 + $0x18] sm:$0xff]  ;;  %v2648_v23 = vld [vmem:[%s5984_s13 + $0x88] sm:$0xff] }
 0x122   :  { %v4386_v29 = vadd.f32 %v3108_v7, %v246_v28  ;;  %3588 = vmatprep.mubr.msk.f32.mxu1 %vm273_vm10, %v5994_v24  ;;  %v725_v28 = vld [vmem:[%s5973_s2 + $0x20] sm:$0xff] }
 0x123   :  { %6043 = vst [vmem:[#allocation19_spill] sm:$0xff] %v4384_v27  ;;  %3589 = vmatmul.mubr.msk.f32.gmra.mrb[4].mxu1 %vm273_vm10, %v5988_v26  ;;  %v5987_v31 = vmax.f32 %v4384_v27, 0.0 }
 0x124   :  { %6044 = vst [vmem:[#allocation20_spill] sm:$0xff] %v4386_v29  ;;  %v5992_v30 = vmax.f32 %v4386_v29, 0.0 }
 0x126   :  { %3591 = vmatprep.mubr.msk.f32.mxu1 %vm273_vm10, %v5992_v30 }
 0x127   :  { %3592 = vmatmul.mubr.msk.f32.gmra.mrb[6].mxu1 %vm273_vm10, %v5987_v31 }
 0x1ee   :  { %v3584_v38 = vpop.f32.mrb[0].mxu1 }
 0x1ef   :  { %v374_v39 = vadd.f32 %v3584_v38, %v3118_v37  ;;  %v368_v40 = vpop.f32.mrb[1].mxu1  ;;  %v732_v38 = vld [vmem:[%s5973_s2 + $0x58] sm:$0xff] }
 0x1f0   :  { %v369_v41 = vadd.f32 %v3118_v37, %v368_v40  ;;  %v734_v40 = vld [vmem:[%s5973_s2 + $0x68] sm:$0xff] }
 0x1f1   :  { %v408_v42 = vmax.f32 %v374_v39, 0.0  ;;  %v733_v39 = vld [vmem:[%s5973_s2 + $0x60] sm:$0xff] }
 0x1f2   :  { %v407_v43 = vmax.f32 %v369_v41, 0.0  ;;  %v3587_v44 = vpop.f32.mrb[2].mxu1  ;;  %v735_v41 = vld [vmem:[%s5973_s2 + $0x70] sm:$0xff] }
 0x1f3   :  { %v384_v45 = vadd.f32 %v3587_v44, %v3118_v37  ;;  %v378_v46 = vpop.f32.mrb[3].mxu1  ;;  %v738_v44 = vld [vmem:[%s5973_s2 + $0x88] sm:$0xff] }
 0x1f4   :  { %v4421_v47 = vpack.c.bf16 %v408_v42, %v407_v43  ;;  %v379_v48 = vadd.f32 %v3118_v37, %v378_v46  ;;  %3608 = vmatprep.mubr.msk.f32.mxu0 %vm429_vm12, %v407_v43  ;;  %v737_v43 = vld [vmem:[%s5973_s2 + $0x80] sm:$0xff]  ;;  %v740_v46 = vld [vmem:[%s5973_s2 + $0x98] sm:$0xff] }
 0x1f5   :  { %v410_v49 = vmax.f32 %v384_v45, 0.0  ;;  %3609 = vmatmul.mubr.msk.f32.vlgmr.msra.gmra.mrb[8].mxu0 %vm429_vm12, %v408_v42  ;;  %v736_v42 = vld [vmem:[%s5973_s2 + $0x78] sm:$0xff]  ;;  %v739_v45 = vld [vmem:[%s5973_s2 + $0x90] sm:$0xff] }
 0x1f6   :  { %v409_v58 = vmax.f32 %v379_v48, 0.0  ;;  %v3590_v59 = vpop.f32.mrb[4].mxu1  ;;  %3899 = vmatprep.subr.bf16.mxu1 %v4421_v47  ;;  %3639 = vmatpush3.msk.msra.mxu0 %vm454_vm11, %v793_v13  ;;  %v741_v48 = vld [vmem:[%s5973_s2 + $0xa0] sm:$0xff]  ;;  %v756_v13 = vld [vmem:[%s5973_s2 + $0x118] sm:$0xff] }
 0x1f7   :  { %v394_v60 = vadd.f32 %v3590_v59, %v3118_v37  ;;  %v388_v61 = vpop.f32.mrb[5].mxu1  ;;  %v744_v59 = vld [vmem:[%s5973_s2 + $0xb8] sm:$0xff] }
 0x1f8   :  { %v4426_v62 = vpack.c.bf16 %v410_v49, %v409_v58  ;;  %v389_v63 = vadd.f32 %v3118_v37, %v388_v61  ;;  %3611 = vmatprep.mubr.msk.f32.mxu0 %vm429_vm12, %v409_v58  ;;  %v743_v58 = vld [vmem:[%s5973_s2 + $0xb0] sm:$0xff]  ;;  %v746_v61 = vld [vmem:[%s5973_s2 + $0xc8] sm:$0xff] }
 0x1f9   :  { %v412_v0 = vmax.f32 %v394_v60, 0.0  ;;  %3612 = vmatmul.mubr.msk.f32.gmra.mrb[10].mxu0 %vm429_vm12, %v410_v49  ;;  %v742_v49 = vld [vmem:[%s5973_s2 + $0xa8] sm:$0xff]  ;;  %v745_v60 = vld [vmem:[%s5973_s2 + $0xc0] sm:$0xff] }
 0x1fa   :  { %v411_v1 = vmax.f32 %v389_v63, 0.0  ;;  %v3593_v2 = vpop.f32.mrb[6].mxu1  ;;  %v747_v63 = vld [vmem:[%s5973_s2 + $0xd0] sm:$0xff] }
 0x1fb   :  { %v404_v3 = vadd.f32 %v3593_v2, %v3118_v37  ;;  %v398_v4 = vpop.f32.mrb[7].mxu1  ;;  %v750_v2 = vld [vmem:[%s5973_s2 + $0xe8] sm:$0xff] }
 0x1fc   :  { %v4430_v5 = vpack.c.bf16 %v412_v0, %v411_v1  ;;  %v399_v6 = vadd.f32 %v3118_v37, %v398_v4  ;;  %3614 = vmatprep.mubr.msk.f32.mxu0 %vm429_vm12, %v411_v1  ;;  %v731_v37 = vld [vmem:[%s5973_s2 + $0x50] sm:$0xff]  ;;  %v749_v1 = vld [vmem:[%s5973_s2 + $0xe0] sm:$0xff]  ;;  %v752_v4 = vld [vmem:[%s5973_s2 + $0xf8] sm:$0xff] }
 0x1fd   :  { %v414_v7 = vmax.f32 %v404_v3, 0.0  ;;  %3615 = vmatmul.mubr.msk.f32.gmra.mrb[12].mxu0 %vm429_vm12, %v412_v0  ;;  %v748_v0 = vld [vmem:[%s5973_s2 + $0xd8] sm:$0xff]  ;;  %v751_v3 = vld [vmem:[%s5973_s2 + $0xf0] sm:$0xff] }
 0x1fe   :  { %v413_v8 = vmax.f32 %v399_v6, 0.0  ;;  %v753_v6 = vld [vmem:[%s5973_s2 + $0x100] sm:$0xff] }
 0x200   :  { %v4434_v10 = vpack.c.bf16 %v414_v7, %v413_v8  ;;  %3617 = vmatprep.mubr.msk.f32.mxu0 %vm429_vm12, %v413_v8  ;;  %v755_v8 = vld [vmem:[%s5973_s2 + $0x110] sm:$0xff] }
 0x201   :  { %3618 = vmatmul.mubr.msk.f32.gmra.mrb[14].mxu0 %vm429_vm12, %v414_v7  ;;  %v754_v7 = vld [vmem:[%s5973_s2 + $0x108] sm:$0xff] }
 0x202   :  { %3640 = vmatprep.mubr.msk.f32.mxu0 %vm801_vm13, %v721_v16  ;;  %v757_v16 = vld [vmem:[%s5973_s2 + $0x120] sm:$0xff] }
 0x205   :  { %3641 = vmatmul.mubr.msk.f32.vlgmr.msra.gmra.mrb[16].mxu0 %vm801_vm13, %v722_v19  ;;  %v758_v19 = vld [vmem:[%s5973_s2 + $0x128] sm:$0xff] }
 0x206   :  { %3643 = vmatprep.mubr.msk.f32.mxu0 %vm801_vm13, %v723_v22  ;;  %v759_v22 = vld [vmem:[%s5973_s2 + $0x130] sm:$0xff] }
 0x209   :  { %3644 = vmatmul.mubr.msk.f32.gmra.mrb[18].mxu0 %vm801_vm13, %v724_v25  ;;  %v760_v25 = vld [vmem:[%s5973_s2 + $0x138] sm:$0xff] }
 0x20a   :  { %3646 = vmatprep.mubr.msk.f32.mxu0 %vm801_vm13, %v725_v28  ;;  %v761_v28 = vld [vmem:[%s5973_s2 + $0x140] sm:$0xff] }
 0x20d   :  { %3647 = vmatmul.mubr.msk.f32.gmra.mrb[20].mxu0 %vm801_vm13, %v726_v32  ;;  %v762_v32 = vld [vmem:[%s5973_s2 + $0x148] sm:$0xff] }
 0x20e   :  { %3649 = vmatprep.mubr.msk.f32.mxu0 %vm801_vm13, %v727_v33  ;;  %v763_v33 = vld [vmem:[%s5973_s2 + $0x150] sm:$0xff] }
 0x211   :  { %3650 = vmatmul.mubr.msk.f32.gmra.mrb[22].mxu0 %vm801_vm13, %v728_v34  ;;  %v764_v34 = vld [vmem:[%s5973_s2 + $0x158] sm:$0xff] }
 0x212   :  { %3652 = vmatprep.mubr.msk.f32.mxu0 %vm801_vm13, %v729_v35  ;;  %v765_v35 = vld [vmem:[%s5973_s2 + $0x160] sm:$0xff] }
 0x215   :  { %3653 = vmatmul.mubr.msk.f32.gmra.mrb[24].mxu0 %vm801_vm13, %v730_v36  ;;  %v766_v36 = vld [vmem:[%s5973_s2 + $0x168] sm:$0xff] }
 0x216   :  { %3655 = vmatprep.mubr.msk.f32.mxu0 %vm801_vm13, %v731_v37  ;;  %v767_v37 = vld [vmem:[%s5973_s2 + $0x170] sm:$0xff] }
 0x219   :  { %3656 = vmatmul.mubr.msk.f32.gmra.mrb[26].mxu0 %vm801_vm13, %v732_v38  ;;  %v768_v38 = vld [vmem:[%s5973_s2 + $0x178] sm:$0xff] }
 0x21a   :  { %3658 = vmatprep.mubr.msk.f32.mxu0 %vm801_vm13, %v733_v39  ;;  %v769_v39 = vld [vmem:[%s5973_s2 + $0x180] sm:$0xff] }
 0x21d   :  { %3659 = vmatmul.mubr.msk.f32.gmra.mrb[28].mxu0 %vm801_vm13, %v734_v40  ;;  %v770_v40 = vld [vmem:[%s5973_s2 + $0x188] sm:$0xff] }
 0x21e   :  { %3661 = vmatprep.mubr.msk.f32.mxu0 %vm801_vm13, %v735_v41  ;;  %v771_v41 = vld [vmem:[%s5973_s2 + $0x190] sm:$0xff] }
 0x221   :  { %3662 = vmatmul.mubr.msk.f32.gmra.mrb[30].mxu0 %vm801_vm13, %v736_v42  ;;  %v772_v42 = vld [vmem:[%s5973_s2 + $0x198] sm:$0xff] }
 0x222   :  { %3664 = vmatprep.mubr.msk.f32.mxu0 %vm801_vm13, %v737_v43  ;;  %v773_v43 = vld [vmem:[%s5973_s2 + $0x1a0] sm:$0xff] }
 0x225   :  { %3665 = vmatmul.mubr.msk.f32.gmra.mrb[32].mxu0 %vm801_vm13, %v738_v44  ;;  %v774_v44 = vld [vmem:[%s5973_s2 + $0x1a8] sm:$0xff] }
 0x226   :  { %3667 = vmatprep.mubr.msk.f32.mxu0 %vm801_vm13, %v739_v45  ;;  %v775_v45 = vld [vmem:[%s5973_s2 + $0x1b0] sm:$0xff] }
 0x229   :  { %3668 = vmatmul.mubr.msk.f32.gmra.mrb[34].mxu0 %vm801_vm13, %v740_v46  ;;  %v776_v46 = vld [vmem:[%s5973_s2 + $0x1b8] sm:$0xff] }
 0x22a   :  { %3670 = vmatprep.mubr.msk.f32.mxu0 %vm801_vm13, %v741_v48  ;;  %v3128_v48 = vld [vmem:[%s5979_s8] ss:$0 sm:$0xff] }
 0x22d   :  { %3671 = vmatmul.mubr.msk.f32.gmra.mrb[36].mxu0 %vm801_vm13, %v742_v49  ;;  %v777_v49 = vld [vmem:[%s5973_s2 + $0x1c0] sm:$0xff] }
 0x22e   :  { %3673 = vmatprep.mubr.msk.f32.mxu0 %vm801_vm13, %v743_v58 }
 0x231   :  { %3674 = vmatmul.mubr.msk.f32.gmra.mrb[38].mxu0 %vm801_vm13, %v744_v59  ;;  %v778_v59 = vld [vmem:[%s5973_s2 + $0x1c8] sm:$0xff] }
 0x232   :  { %3676 = vmatprep.mubr.msk.f32.mxu0 %vm801_vm13, %v745_v60 }
 0x235   :  { %3677 = vmatmul.mubr.msk.f32.gmra.mrb[40].mxu0 %vm801_vm13, %v746_v61 }
 0x236   :  { %3679 = vmatprep.mubr.msk.f32.mxu0 %vm801_vm13, %v747_v63 }
 0x239   :  { %3680 = vmatmul.mubr.msk.f32.gmra.mrb[42].mxu0 %vm801_vm13, %v748_v0  ;;  %v779_v0 = vld [vmem:[%s5973_s2 + $0x1d0] sm:$0xff] }
 0x23a   :  { %3682 = vmatprep.mubr.msk.f32.mxu0 %vm801_vm13, %v749_v1 }
 0x23d   :  { %3683 = vmatmul.mubr.msk.f32.gmra.mrb[44].mxu0 %vm801_vm13, %v750_v2 }
 0x23e   :  { %3685 = vmatprep.mubr.msk.f32.mxu0 %vm801_vm13, %v751_v3  ;;  %v780_v3 = vld [vmem:[%s5973_s2 + $0x1d8] sm:$0xff] }
 0x241   :  { %3686 = vmatmul.mubr.msk.f32.gmra.mrb[46].mxu0 %vm801_vm13, %v752_v4 }
 0x242   :  { %3688 = vmatprep.mubr.msk.f32.mxu0 %vm801_vm13, %v753_v6 }
 0x245   :  { %3689 = vmatmul.mubr.msk.f32.gmra.mrb[48].mxu0 %vm801_vm13, %v754_v7 }
 0x246   :  { %3691 = vmatprep.mubr.msk.f32.mxu0 %vm801_vm13, %v755_v8 }
 0x249   :  { %3692 = vmatmul.mubr.msk.f32.gmra.mrb[50].mxu0 %vm801_vm13, %v756_v13  ;;  %v781_v13 = vld [vmem:[%s5973_s2 + $0x1e0] sm:$0xff] }
 0x24a   :  { %3694 = vmatprep.mubr.msk.f32.mxu0 %vm801_vm13, %v757_v16 }
 0x24d   :  { %3695 = vmatmul.mubr.msk.f32.gmra.mrb[52].mxu0 %vm801_vm13, %v758_v19 }
 0x24e   :  { %3697 = vmatprep.mubr.msk.f32.mxu0 %vm801_vm13, %v759_v22  ;;  %v782_v22 = vld [vmem:[%s5973_s2 + $0x1e8] sm:$0xff] }
 0x251   :  { %3698 = vmatmul.mubr.msk.f32.gmra.mrb[54].mxu0 %vm801_vm13, %v760_v25 }
 0x252   :  { %3700 = vmatprep.mubr.msk.f32.mxu0 %vm801_vm13, %v761_v28 }
 0x255   :  { %3701 = vmatmul.mubr.msk.f32.gmra.mrb[56].mxu0 %vm801_vm13, %v762_v32 }
 0x256   :  { %3703 = vmatprep.mubr.msk.f32.mxu0 %vm801_vm13, %v763_v33 }
 0x259   :  { %3704 = vmatmul.mubr.msk.f32.gmra.mrb[58].mxu0 %vm801_vm13, %v764_v34 }
 0x25a   :  { %3706 = vmatprep.mubr.msk.f32.mxu0 %vm801_vm13, %v765_v35 }
 0x25d   :  { %3707 = vmatmul.mubr.msk.f32.gmra.mrb[60].mxu0 %vm801_vm13, %v766_v36  ;;  %v784_v36 = vld [vmem:[%s5973_s2 + $0x1f8] sm:$0xff] }
 0x25e   :  { %3709 = vmatprep.mubr.msk.f32.mxu0 %vm801_vm13, %v767_v37 }
 0x261   :  { %3710 = vmatmul.mubr.msk.f32.gmra.mrb[62].mxu0 %vm801_vm13, %v768_v38 }
 0x262   :  { %3712 = vmatprep.mubr.msk.f32.mxu0 %vm801_vm13, %v769_v39 }
 0x265   :  { %3713 = vmatmul.mubr.msk.f32.gmra.mrb[64].mxu0 %vm801_vm13, %v770_v40 }
 0x266   :  { %3715 = vmatprep.mubr.msk.f32.mxu0 %vm801_vm13, %v771_v41 }
 0x269   :  { %3716 = vmatmul.mubr.msk.f32.gmra.mrb[66].mxu0 %vm801_vm13, %v772_v42  ;;  %v786_v42 = vld [vmem:[%s5973_s2 + $0x208] sm:$0xff] }
 0x26a   :  { %3718 = vmatprep.mubr.msk.f32.mxu0 %vm801_vm13, %v773_v43 }
 0x26d   :  { %3719 = vmatmul.mubr.msk.f32.gmra.mrb[68].mxu0 %vm801_vm13, %v774_v44  ;;  %v1518_v44 = vld [vmem:[%s5972_s1] sm:$0xff] }
 0x26e   :  { %3721 = vmatprep.mubr.msk.f32.mxu0 %vm801_vm13, %v775_v45  ;;  %v1520_v45 = vld [vmem:[%s5972_s1 + $0x10] sm:$0xff] }
 0x271   :  { %3722 = vmatmul.mubr.msk.f32.gmra.mrb[70].mxu0 %vm801_vm13, %v776_v46  ;;  %v787_v46 = vld [vmem:[%s5973_s2 + $0x210] sm:$0xff] }
 0x272   :  { %3724 = vmatprep.mubr.msk.f32.mxu0 %vm801_vm13, %v777_v49  ;;  %v1522_v49 = vld [vmem:[%s5972_s1 + $0x20] sm:$0xff] }
 0x275   :  { %3725 = vmatmul.mubr.msk.f32.gmra.mrb[72].mxu0 %vm801_vm13, %v778_v59  ;;  %v790_v59 = vld [vmem:[%s5973_s2 + $0x228] sm:$0xff] }
 0x276   :  { %3727 = vmatprep.mubr.msk.f32.mxu0 %vm801_vm13, %v779_v0  ;;  %v1524_v0 = vld [vmem:[%s5972_s1 + $0x30] sm:$0xff] }
 0x279   :  { %3728 = vmatmul.mubr.msk.f32.gmra.mrb[74].mxu0 %vm801_vm13, %v780_v3  ;;  %v792_v3 = vld [vmem:[%s5973_s2 + $0x238] sm:$0xff] }
 0x27a   :  { %3730 = vmatprep.mubr.msk.f32.mxu0 %vm801_vm13, %v781_v13  ;;  %v1526_v13 = vld [vmem:[%s5972_s1 + $0x40] sm:$0xff] }
 0x27d   :  { %3731 = vmatmul.mubr.msk.f32.gmra.mrb[76].mxu0 %vm801_vm13, %v782_v22  ;;  %v1528_v22 = vld [vmem:[%s5972_s1 + $0x50] sm:$0xff] }
 0x2c8   :  { %v3610_v58 = vpop.f32.mrb[8].mxu0 }
 0x2c9   :  { %v4677_v60 = vadd.f32 %v3610_v58, %v3128_v48  ;;  %v524_v61 = vpop.f32.mrb[9].mxu0  ;;  %v789_v58 = vld [vmem:[%s5973_s2 + $0x220] sm:$0xff] }
 0x2ca   :  { %v4679_v63 = vadd.f32 %v3128_v48, %v524_v61  ;;  %v1523_v61 = vld [vmem:[%s5972_s1 + $0x28] sm:$0xff] }
 0x2cb   :  { %6045 = vst [vmem:[#allocation21_spill] sm:$0xff] %v4677_v60  ;;  %v5997_v4 = vmax.f32 %v4677_v60, 0.0 }
 0x2cc   :  { %6046 = vst [vmem:[#allocation22_spill] sm:$0xff] %v4679_v63  ;;  %v6002_v1 = vmax.f32 %v4679_v63, 0.0  ;;  %v3613_v2 = vpop.f32.mrb[10].mxu0  ;;  %v6027_v63 = vmov 0.0|0.0  }
 0x2cd   :  { %v4691_v6 = vadd.f32 %v3613_v2, %v3128_v48  ;;  %v534_v7 = vpop.f32.mrb[11].mxu0  ;;  %v791_v2 = vld [vmem:[%s5973_s2 + $0x230] sm:$0xff] }
 0x2ce   :  { %v4693_v8 = vadd.f32 %v3128_v48, %v534_v7  ;;  %3626 = vmatprep.mubr.msk.f32.mxu1 %vm273_vm10, %v6002_v1  ;;  %v1525_v7 = vld [vmem:[%s5972_s1 + $0x38] sm:$0xff] }
 0x2cf   :  { %6047 = vst [vmem:[#allocation23_spill] sm:$0xff] %v4691_v6  ;;  %3627 = vmatmul.mubr.msk.f32.vlgmr.msra.gmra.mrb[8].mxu1 %vm273_vm10, %v5997_v4  ;;  %v5995_v25 = vmax.f32 %v4691_v6, 0.0 }
 0x2d0   :  { %6048 = vst [vmem:[#allocation24_spill] sm:$0xff] %v4693_v8  ;;  %v6001_v16 = vmax.f32 %v4693_v8, 0.0  ;;  %3901 = vmatpush3.bf16.msra.mxu1 %v4421_v47  ;;  %v3616_v19 = vpop.f32.mrb[12].mxu0  ;;  %v783_v47 = vld [vmem:[%s5973_s2 + $0x1f0] sm:$0xff] }
 0x2d1   :  { %v4712_v28 = vadd.f32 %v3616_v19, %v3128_v48  ;;  %3903 = vmatprep.subr.bf16.mxu1 %v4426_v62  ;;  %v544_v32 = vpop.f32.mrb[13].mxu0  ;;  %3733 = vmatprep.mubr.msk.f32.mxu0 %vm801_vm13, %v783_v47  ;;  %v1527_v19 = vld [vmem:[%s5972_s1 + $0x48] sm:$0xff]  ;;  %v1530_v47 = vld [vmem:[%s5972_s1 + $0x60] sm:$0xff] }
 0x2d2   :  { %v4715_v33 = vadd.f32 %v3128_v48, %v544_v32  ;;  %3629 = vmatprep.mubr.msk.f32.mxu1 %vm273_vm10, %v6001_v16  ;;  %3734 = vmatmul.mubr.msk.f32.gmra.mrb[78].mxu0 %vm801_vm13, %v784_v36  ;;  %v1529_v32 = vld [vmem:[%s5972_s1 + $0x58] sm:$0xff]  ;;  %v1532_v36 = vld [vmem:[%s5972_s1 + $0x70] sm:$0xff] }
 0x2d3   :  { %6049 = vst [vmem:[#allocation25_spill] sm:$0xff] %v4712_v28  ;;  %3630 = vmatmul.mubr.msk.f32.gmra.mrb[10].mxu1 %vm273_vm10, %v5995_v25  ;;  %v5993_v37 = vmax.f32 %v4712_v28, 0.0  ;;  %v2647_v28 = vld [vmem:[%s5984_s13 + $0x80] sm:$0xff] }
 0x2d4   :  { %6050 = vst [vmem:[#allocation26_spill] sm:$0xff] %v4715_v33  ;;  %v6000_v34 = vmax.f32 %v4715_v33, 0.0  ;;  %3905 = vmatpush3.bf16.msra.mxu1 %v4426_v62  ;;  %v3619_v35 = vpop.f32.mrb[14].mxu0  ;;  %v785_v62 = vld [vmem:[%s5973_s2 + $0x200] sm:$0xff]  ;;  %v3914_v60 = vpack.c.bf16 %v2648_v23, %v2647_v28  ;;  %v3916_v33 = vpack.c.bf16 %v2632_v11, %v2631_v17  ;;  %v2664_v28 = vld [vmem:[%s5984_s13 + $0x108] sm:$0xff] }
 0x2d5   :  { %v4734_v38 = vadd.f32 %v3619_v35, %v3128_v48  ;;  %3907 = vmatprep.subr.bf16.mxu1 %v4430_v5  ;;  %v554_v39 = vpop.f32.mrb[15].mxu0  ;;  %3736 = vmatprep.mubr.msk.f32.mxu0 %vm801_vm13, %v785_v62  ;;  %v1531_v35 = vld [vmem:[%s5972_s1 + $0x68] sm:$0xff]  ;;  %v1534_v62 = vld [vmem:[%s5972_s1 + $0x80] sm:$0xff] }
 0x2d6   :  { %v4737_v40 = vadd.f32 %v3128_v48, %v554_v39  ;;  %3632 = vmatprep.mubr.msk.f32.mxu1 %vm273_vm10, %v6000_v34  ;;  %3737 = vmatmul.mubr.msk.f32.gmra.mrb[80].mxu0 %vm801_vm13, %v786_v42  ;;  %v1521_v48 = vld [vmem:[%s5972_s1 + $0x18] sm:$0xff]  ;;  %v1535_v42 = vld [vmem:[%s5972_s1 + $0x88] sm:$0xff]  ;;  %v2663_v23 = vld [vmem:[%s5984_s13 + $0x100] sm:$0xff] }
 0x2d7   :  { %6051 = vst [vmem:[#allocation27_spill] sm:$0xff] %v4734_v38  ;;  %3633 = vmatmul.mubr.msk.f32.gmra.mrb[12].mxu1 %vm273_vm10, %v5993_v37  ;;  %v5991_v43 = vmax.f32 %v4734_v38, 0.0  ;;  %3739 = vmatprep.mubr.msk.f32.mxu0 %vm801_vm13, %v787_v46  ;;  %v1533_v39 = vld [vmem:[%s5972_s1 + $0x78] sm:$0xff]  ;;  %v1539_v46 = vld [vmem:[%s5972_s1 + $0xa8] sm:$0xff] }
 0x2d8   :  { %6052 = vst [vmem:[#allocation28_spill] sm:$0xff] %v4737_v40  ;;  %v5999_v41 = vmax.f32 %v4737_v40, 0.0  ;;  %3909 = vmatpush3.bf16.msra.mxu1 %v4430_v5  ;;  %v1519_v5 = vld [vmem:[%s5972_s1 + $0x8] sm:$0xff]  ;;  %3915 = vmatprep.subr.bf16.mxu0 %v3914_v60 }
 0x2d9   :  { %3911 = vmatprep.subr.bf16.mxu1 %v4434_v10  ;;  %3917 = vmatpush3.bf16.msra.mxu0 %v3916_v33 }
 0x2da   :  { %3635 = vmatprep.mubr.msk.f32.mxu1 %vm273_vm10, %v5999_v41 }
 0x2db   :  { %3636 = vmatmul.mubr.msk.f32.gmra.mrb[14].mxu1 %vm273_vm10, %v5991_v43 }
 0x2dc   :  { %3913 = vmatpush3.bf16.msra.mxu1 %v4434_v10  ;;  %3764 = vmatprep.mubr.msk.f32.mxu1 %vm1590_vm14, %v1518_v44  ;;  %v788_v10 = vld [vmem:[%s5973_s2 + $0x218] sm:$0xff]  ;;  %v1536_v44 = vld [vmem:[%s5972_s1 + $0x90] sm:$0xff]  ;;  %s4159_s2 = smov 88  }
 0x2dd   :  { %3740 = vmatmul.mubr.msk.f32.gmra.mrb[82].mxu0 %vm801_vm13, %v788_v10  ;;  %v1540_v10 = vld [vmem:[%s5972_s1 + $0xb0] sm:$0xff]  ;;  %3946 = vmatprep.subr.bf16.mxu1 %v6027_v63 }
 0x2de   :  { %3742 = vmatprep.mubr.msk.f32.mxu0 %vm801_vm13, %v789_v58  ;;  %v1543_v58 = vld [vmem:[%s5972_s1 + $0xc8] sm:$0xff] }
 0x2df   :  { %3765 = vmatmul.mubr.msk.f32.vlgmr.msra.gmra.mrb[16].mxu1 %vm1590_vm14, %v1519_v5  ;;  %v1537_v5 = vld [vmem:[%s5972_s1 + $0x98] sm:$0xff] }
 0x2e0   :  { %3767 = vmatprep.mubr.msk.f32.mxu1 %vm1590_vm14, %v1520_v45  ;;  %v1538_v45 = vld [vmem:[%s5972_s1 + $0xa0] sm:$0xff] }
 0x2e1   :  { %3743 = vmatmul.mubr.msk.f32.gmra.mrb[84].mxu0 %vm801_vm13, %v790_v59  ;;  %v1544_v59 = vld [vmem:[%s5972_s1 + $0xd0] sm:$0xff] }
 0x2e2   :  { %3745 = vmatprep.mubr.msk.f32.mxu0 %vm801_vm13, %v791_v2  ;;  %v1547_v2 = vld [vmem:[%s5972_s1 + $0xe8] sm:$0xff] }
 0x2e3   :  { %3768 = vmatmul.mubr.msk.f32.gmra.mrb[18].mxu1 %vm1590_vm14, %v1521_v48  ;;  %v1541_v48 = vld [vmem:[%s5972_s1 + $0xb8] sm:$0xff] }
 0x2e4   :  { %3770 = vmatprep.mubr.msk.f32.mxu1 %vm1590_vm14, %v1522_v49  ;;  %v1542_v49 = vld [vmem:[%s5972_s1 + $0xc0] sm:$0xff] }
 0x2e5   :  { %3746 = vmatmul.mubr.msk.f32.gmra.mrb[86].mxu0 %vm801_vm13, %v792_v3  ;;  %v1548_v3 = vld [vmem:[%s5972_s1 + $0xf0] sm:$0xff] }
 0x2e7   :  { %3771 = vmatmul.mubr.msk.f32.gmra.mrb[20].mxu1 %vm1590_vm14, %v1523_v61  ;;  %v1545_v61 = vld [vmem:[%s5972_s1 + $0xd8] sm:$0xff] }
 0x2e8   :  { %3773 = vmatprep.mubr.msk.f32.mxu1 %vm1590_vm14, %v1524_v0  ;;  %v1546_v0 = vld [vmem:[%s5972_s1 + $0xe0] sm:$0xff] }
 0x2eb   :  { %3774 = vmatmul.mubr.msk.f32.gmra.mrb[22].mxu1 %vm1590_vm14, %v1525_v7  ;;  %v1549_v7 = vld [vmem:[%s5972_s1 + $0xf8] sm:$0xff] }
 0x2ec   :  { %3776 = vmatprep.mubr.msk.f32.mxu1 %vm1590_vm14, %v1526_v13  ;;  %v1550_v13 = vld [vmem:[%s5972_s1 + $0x100] sm:$0xff] }
 0x2ef   :  { %3777 = vmatmul.mubr.msk.f32.gmra.mrb[24].mxu1 %vm1590_vm14, %v1527_v19  ;;  %v1551_v19 = vld [vmem:[%s5972_s1 + $0x108] sm:$0xff] }
 0x2f0   :  { %3779 = vmatprep.mubr.msk.f32.mxu1 %vm1590_vm14, %v1528_v22  ;;  %v1552_v22 = vld [vmem:[%s5972_s1 + $0x110] sm:$0xff] }
 0x2f3   :  { %3780 = vmatmul.mubr.msk.f32.gmra.mrb[26].mxu1 %vm1590_vm14, %v1529_v32  ;;  %v1553_v32 = vld [vmem:[%s5972_s1 + $0x118] sm:$0xff] }
 0x2f4   :  { %3782 = vmatprep.mubr.msk.f32.mxu1 %vm1590_vm14, %v1530_v47  ;;  %v1554_v47 = vld [vmem:[%s5972_s1 + $0x120] sm:$0xff] }
 0x2f7   :  { %3783 = vmatmul.mubr.msk.f32.gmra.mrb[28].mxu1 %vm1590_vm14, %v1531_v35  ;;  %v1555_v35 = vld [vmem:[%s5972_s1 + $0x128] sm:$0xff] }
 0x2f8   :  { %3785 = vmatprep.mubr.msk.f32.mxu1 %vm1590_vm14, %v1532_v36  ;;  %v1556_v36 = vld [vmem:[%s5972_s1 + $0x130] sm:$0xff] }
 0x2fb   :  { %3786 = vmatmul.mubr.msk.f32.gmra.mrb[30].mxu1 %vm1590_vm14, %v1533_v39  ;;  %v1557_v39 = vld [vmem:[%s5972_s1 + $0x138] sm:$0xff] }
 0x2fc   :  { %3788 = vmatprep.mubr.msk.f32.mxu1 %vm1590_vm14, %v1534_v62  ;;  %v1558_v62 = vld [vmem:[%s5972_s1 + $0x140] sm:$0xff] }
 0x2ff   :  { %3789 = vmatmul.mubr.msk.f32.gmra.mrb[32].mxu1 %vm1590_vm14, %v1535_v42  ;;  %v1559_v42 = vld [vmem:[%s5972_s1 + $0x148] sm:$0xff] }
 0x300   :  { %3791 = vmatprep.mubr.msk.f32.mxu1 %vm1590_vm14, %v1536_v44  ;;  %v1560_v44 = vld [vmem:[%s5972_s1 + $0x150] sm:$0xff] }
 0x303   :  { %3792 = vmatmul.mubr.msk.f32.gmra.mrb[34].mxu1 %vm1590_vm14, %v1537_v5  ;;  %v4959_v5 = vpop.f32.mrb[16].mxu0 }
 0x304   :  { %3794 = vmatprep.mubr.msk.f32.mxu1 %vm1590_vm14, %v1538_v45  ;;  %v4962_v45 = vpop.f32.mrb[17].mxu0 }
 0x307   :  { %3795 = vmatmul.mubr.msk.f32.gmra.mrb[36].mxu1 %vm1590_vm14, %v1539_v46  ;;  %v1561_v46 = vld [vmem:[%s5972_s1 + $0x158] sm:$0xff] }
 0x308   :  { %3797 = vmatprep.mubr.msk.f32.mxu1 %vm1590_vm14, %v1540_v10  ;;  %v1562_v10 = vld [vmem:[%s5972_s1 + $0x160] sm:$0xff] }
 0x30b   :  { %3798 = vmatmul.mubr.msk.f32.gmra.mrb[38].mxu1 %vm1590_vm14, %v1541_v48  ;;  %v4971_v48 = vpop.f32.mrb[18].mxu0 }
 0x30c   :  { %3800 = vmatprep.mubr.msk.f32.mxu1 %vm1590_vm14, %v1542_v49  ;;  %v4974_v49 = vpop.f32.mrb[19].mxu0 }
 0x30f   :  { %3801 = vmatmul.mubr.msk.f32.gmra.mrb[40].mxu1 %vm1590_vm14, %v1543_v58  ;;  %v1563_v58 = vld [vmem:[%s5972_s1 + $0x168] sm:$0xff] }
 0x310   :  { %3803 = vmatprep.mubr.msk.f32.mxu1 %vm1590_vm14, %v1544_v59  ;;  %v1564_v59 = vld [vmem:[%s5972_s1 + $0x170] sm:$0xff] }
 0x313   :  { %3804 = vmatmul.mubr.msk.f32.gmra.mrb[42].mxu1 %vm1590_vm14, %v1545_v61  ;;  %v4983_v61 = vpop.f32.mrb[20].mxu0 }
 0x314   :  { %3806 = vmatprep.mubr.msk.f32.mxu1 %vm1590_vm14, %v1546_v0  ;;  %v4986_v0 = vpop.f32.mrb[21].mxu0 }
 0x317   :  { %3807 = vmatmul.mubr.msk.f32.gmra.mrb[44].mxu1 %vm1590_vm14, %v1547_v2  ;;  %v1565_v2 = vld [vmem:[%s5972_s1 + $0x178] sm:$0xff] }
 0x318   :  { %3809 = vmatprep.mubr.msk.f32.mxu1 %vm1590_vm14, %v1548_v3  ;;  %v1566_v3 = vld [vmem:[%s5972_s1 + $0x180] sm:$0xff] }
 0x31b   :  { %3810 = vmatmul.mubr.msk.f32.gmra.mrb[46].mxu1 %vm1590_vm14, %v1549_v7  ;;  %v4995_v7 = vpop.f32.mrb[22].mxu0 }
 0x31c   :  { %3812 = vmatprep.mubr.msk.f32.mxu1 %vm1590_vm14, %v1550_v13  ;;  %v4998_v13 = vpop.f32.mrb[23].mxu0 }
 0x31f   :  { %3813 = vmatmul.mubr.msk.f32.gmra.mrb[48].mxu1 %vm1590_vm14, %v1551_v19  ;;  %v1567_v19 = vld [vmem:[%s5972_s1 + $0x188] sm:$0xff] }
 0x320   :  { %3815 = vmatprep.mubr.msk.f32.mxu1 %vm1590_vm14, %v1552_v22  ;;  %v1568_v22 = vld [vmem:[%s5972_s1 + $0x190] sm:$0xff] }
 0x323   :  { %3816 = vmatmul.mubr.msk.f32.gmra.mrb[50].mxu1 %vm1590_vm14, %v1553_v32  ;;  %v5007_v32 = vpop.f32.mrb[24].mxu0 }
 0x324   :  { %3818 = vmatprep.mubr.msk.f32.mxu1 %vm1590_vm14, %v1554_v47  ;;  %v5010_v47 = vpop.f32.mrb[25].mxu0 }
 0x327   :  { %3819 = vmatmul.mubr.msk.f32.gmra.mrb[52].mxu1 %vm1590_vm14, %v1555_v35  ;;  %v1569_v35 = vld [vmem:[%s5972_s1 + $0x198] sm:$0xff] }
 0x328   :  { %3821 = vmatprep.mubr.msk.f32.mxu1 %vm1590_vm14, %v1556_v36  ;;  %v1570_v36 = vld [vmem:[%s5972_s1 + $0x1a0] sm:$0xff] }
 0x32b   :  { %3822 = vmatmul.mubr.msk.f32.gmra.mrb[54].mxu1 %vm1590_vm14, %v1557_v39  ;;  %v5019_v39 = vpop.f32.mrb[26].mxu0 }
 0x32c   :  { %3824 = vmatprep.mubr.msk.f32.mxu1 %vm1590_vm14, %v1558_v62  ;;  %v5022_v62 = vpop.f32.mrb[27].mxu0 }
 0x32f   :  { %3825 = vmatmul.mubr.msk.f32.gmra.mrb[56].mxu1 %vm1590_vm14, %v1559_v42  ;;  %v1571_v42 = vld [vmem:[%s5972_s1 + $0x1a8] sm:$0xff] }
 0x330   :  { %3827 = vmatprep.mubr.msk.f32.mxu1 %vm1590_vm14, %v1560_v44  ;;  %v1572_v44 = vld [vmem:[%s5972_s1 + $0x1b0] sm:$0xff] }
 0x333   :  { %3828 = vmatmul.mubr.msk.f32.gmra.mrb[58].mxu1 %vm1590_vm14, %v1561_v46  ;;  %v5031_v46 = vpop.f32.mrb[28].mxu0 }
 0x334   :  { %3830 = vmatprep.mubr.msk.f32.mxu1 %vm1590_vm14, %v1562_v10  ;;  %v5034_v10 = vpop.f32.mrb[29].mxu0 }
 0x337   :  { %3831 = vmatmul.mubr.msk.f32.gmra.mrb[60].mxu1 %vm1590_vm14, %v1563_v58  ;;  %v1573_v58 = vld [vmem:[%s5972_s1 + $0x1b8] sm:$0xff] }
 0x338   :  { %3833 = vmatprep.mubr.msk.f32.mxu1 %vm1590_vm14, %v1564_v59  ;;  %v1574_v59 = vld [vmem:[%s5972_s1 + $0x1c0] sm:$0xff] }
 0x33b   :  { %3834 = vmatmul.mubr.msk.f32.gmra.mrb[62].mxu1 %vm1590_vm14, %v1565_v2  ;;  %v5043_v2 = vpop.f32.mrb[30].mxu0 }
 0x33c   :  { %3836 = vmatprep.mubr.msk.f32.mxu1 %vm1590_vm14, %v1566_v3  ;;  %v5046_v3 = vpop.f32.mrb[31].mxu0 }
 0x33f   :  { %3837 = vmatmul.mubr.msk.f32.gmra.mrb[64].mxu1 %vm1590_vm14, %v1567_v19  ;;  %v1575_v19 = vld [vmem:[%s5972_s1 + $0x1c8] sm:$0xff] }
 0x340   :  { %3839 = vmatprep.mubr.msk.f32.mxu1 %vm1590_vm14, %v1568_v22  ;;  %v1576_v22 = vld [vmem:[%s5972_s1 + $0x1d0] sm:$0xff] }
 0x343   :  { %3840 = vmatmul.mubr.msk.f32.gmra.mrb[66].mxu1 %vm1590_vm14, %v1569_v35  ;;  %v5055_v35 = vpop.f32.mrb[32].mxu0 }
 0x344   :  { %3842 = vmatprep.mubr.msk.f32.mxu1 %vm1590_vm14, %v1570_v36  ;;  %v5058_v36 = vpop.f32.mrb[33].mxu0 }
 0x347   :  { %3843 = vmatmul.mubr.msk.f32.gmra.mrb[68].mxu1 %vm1590_vm14, %v1571_v42  ;;  %v1577_v42 = vld [vmem:[%s5972_s1 + $0x1d8] sm:$0xff] }
 0x348   :  { %3845 = vmatprep.mubr.msk.f32.mxu1 %vm1590_vm14, %v1572_v44  ;;  %v1578_v44 = vld [vmem:[%s5972_s1 + $0x1e0] sm:$0xff] }
 0x34b   :  { %3846 = vmatmul.mubr.msk.f32.gmra.mrb[70].mxu1 %vm1590_vm14, %v1573_v58  ;;  %v5067_v58 = vpop.f32.mrb[34].mxu0 }
 0x34c   :  { %3848 = vmatprep.mubr.msk.f32.mxu1 %vm1590_vm14, %v1574_v59  ;;  %v5070_v59 = vpop.f32.mrb[35].mxu0 }
 0x34d   :  { %v5079_v31 = vpop.f32.mrb[36].mxu0 }
 0x34e   :  { %v5082_v26 = vpop.f32.mrb[37].mxu0 }
 0x34f   :  { %3849 = vmatmul.mubr.msk.f32.gmra.mrb[72].mxu1 %vm1590_vm14, %v1575_v19  ;;  %v1579_v19 = vld [vmem:[%s5972_s1 + $0x1e8] sm:$0xff]  ;;  %v5091_v20 = vpop.f32.mrb[38].mxu0 }
 0x350   :  { %3851 = vmatprep.mubr.msk.f32.mxu1 %vm1590_vm14, %v1576_v22  ;;  %v1580_v22 = vld [vmem:[%s5972_s1 + $0x1f0] sm:$0xff]  ;;  %v5094_v14 = vpop.f32.mrb[39].mxu0 }
 0x351   :  { %v5103_v43 = vpop.f32.mrb[40].mxu0 }
 0x352   :  { %v5106_v30 = vpop.f32.mrb[41].mxu0 }
 0x353   :  { %3852 = vmatmul.mubr.msk.f32.gmra.mrb[74].mxu1 %vm1590_vm14, %v1577_v42  ;;  %v1581_v42 = vld [vmem:[%s5972_s1 + $0x1f8] sm:$0xff]  ;;  %v5115_v37 = vpop.f32.mrb[42].mxu0 }
 0x354   :  { %3854 = vmatprep.mubr.msk.f32.mxu1 %vm1590_vm14, %v1578_v44  ;;  %v1582_v44 = vld [vmem:[%s5972_s1 + $0x200] sm:$0xff]  ;;  %v5118_v24 = vpop.f32.mrb[43].mxu0 }
 0x355   :  { %v5127_v25 = vpop.f32.mrb[44].mxu0 }
 0x356   :  { %v5130_v18 = vpop.f32.mrb[45].mxu0 }
 0x357   :  { %3855 = vmatmul.mubr.msk.f32.gmra.mrb[76].mxu1 %vm1590_vm14, %v1579_v19  ;;  %v1583_v19 = vld [vmem:[%s5972_s1 + $0x208] sm:$0xff] }
 0x358   :  { %3857 = vmatprep.mubr.msk.f32.mxu1 %vm1590_vm14, %v1580_v22  ;;  %v1584_v22 = vld [vmem:[%s5972_s1 + $0x210] sm:$0xff] }
 0x35b   :  { %3858 = vmatmul.mubr.msk.f32.gmra.mrb[78].mxu1 %vm1590_vm14, %v1581_v42  ;;  %v1585_v42 = vld [vmem:[%s5972_s1 + $0x218] sm:$0xff] }
 0x35c   :  { %3860 = vmatprep.mubr.msk.f32.mxu1 %vm1590_vm14, %v1582_v44  ;;  %v1586_v44 = vld [vmem:[%s5972_s1 + $0x220] sm:$0xff] }
 0x35f   :  { %3861 = vmatmul.mubr.msk.f32.gmra.mrb[80].mxu1 %vm1590_vm14, %v1583_v19  ;;  %v1587_v19 = vld [vmem:[%s5972_s1 + $0x228] sm:$0xff] }
 0x360   :  { %3863 = vmatprep.mubr.msk.f32.mxu1 %vm1590_vm14, %v1584_v22  ;;  %v1588_v22 = vld [vmem:[%s5972_s1 + $0x230] sm:$0xff] }
 0x363   :  { %3864 = vmatmul.mubr.msk.f32.gmra.mrb[82].mxu1 %vm1590_vm14, %v1585_v42  ;;  %v1589_v42 = vld [vmem:[%s5972_s1 + $0x238] sm:$0xff] }
 0x364   :  { %3866 = vmatprep.mubr.msk.f32.mxu1 %vm1590_vm14, %v1586_v44  ;;  %v5136_v44 = vpop.f32.mrb[46].mxu0 }
 0x365   :  { %v5139_v4 = vpop.f32.mrb[47].mxu0 }
 0x366   :  { %v5141_v12 = vpop.f32.mrb[48].mxu0 }
 0x367   :  { %3867 = vmatmul.mubr.msk.f32.gmra.mrb[84].mxu1 %vm1590_vm14, %v1587_v19  ;;  %v5143_v41 = vpop.f32.mrb[49].mxu0 }
 0x368   :  { %3869 = vmatprep.mubr.msk.f32.mxu1 %vm1590_vm14, %v1588_v22  ;;  %v5145_v34 = vpop.f32.mrb[50].mxu0 }
 0x369   :  { %v5147_v19 = vpop.f32.mrb[51].mxu0 }
 0x36a   :  { %v5149_v16 = vpop.f32.mrb[52].mxu0 }
 0x36b   :  { %3870 = vmatmul.mubr.msk.f32.gmra.mrb[86].mxu1 %vm1590_vm14, %v1589_v42  ;;  %v5151_v22 = vpop.f32.mrb[53].mxu0 }
 0x36c   :  { %v5153_v1 = vpop.f32.mrb[54].mxu0 }
 0x36d   :  { %v5155_v57 = vpop.f32.mrb[55].mxu0 }
 0x36e   :  { %v5157_v56 = vpop.f32.mrb[56].mxu0 }
 0x36f   :  { %v5159_v42 = vpop.f32.mrb[57].mxu0 }
 0x370   :  { %v5161_v55 = vpop.f32.mrb[58].mxu0 }
 0x371   :  { %v5163_v54 = vpop.f32.mrb[59].mxu0 }
 0x372   :  { %v5165_v53 = vpop.f32.mrb[60].mxu0 }
 0x373   :  { %v5167_v52 = vpop.f32.mrb[61].mxu0 }
 0x374   :  { %v5169_v51 = vpop.f32.mrb[62].mxu0 }
 0x375   :  { %v5171_v50 = vpop.f32.mrb[63].mxu0 }
 0x376   :  { %v5173_v27 = vpop.f32.mrb[64].mxu0 }
 0x377   :  { %v5175_v21 = vpop.f32.mrb[65].mxu0 }
 0x378   :  { %6053 = vst [vmem:[#allocation29_spill] sm:$0xff] %v5175_v21  ;;  %v5177_v15 = vpop.f32.mrb[66].mxu0 }
 0x379   :  { %6054 = vst [vmem:[#allocation30_spill] sm:$0xff] %v5177_v15  ;;  %v5179_v9 = vpop.f32.mrb[67].mxu0 }
 0x37a   :  { %6055 = vst [vmem:[#allocation31_spill] sm:$0xff] %v5179_v9  ;;  %v5181_v38 = vpop.f32.mrb[68].mxu0 }
 0x37b   :  { %6056 = vst [vmem:[#allocation32_spill] sm:$0xff] %v5181_v38  ;;  %v5183_v29 = vpop.f32.mrb[69].mxu0 }
 0x37c   :  { %6057 = vst [vmem:[#allocation33_spill] sm:$0xff] %v5183_v29  ;;  %v5191_v6 = vpop.f32.mrb[70].mxu0  ;;  %v3947_v29 = vpack.c.bf16 %v2664_v28, %v2663_v23  ;;  %v2665_v23 = vld [vmem:[%s5984_s13 + $0x110] sm:$0xff]  ;;  %v2666_v28 = vld [vmem:[%s5984_s13 + $0x118] sm:$0xff] }
 0x37d   :  { %6058 = vst [vmem:[#allocation34_spill] sm:$0xff] %v5191_v6  ;;  %v5199_v40 = vpop.f32.mrb[71].mxu0 }
 0x37e   :  { %6059 = vst [vmem:[#allocation35_spill] sm:$0xff] %v5199_v40  ;;  %v5201_v8 = vpop.f32.mrb[72].mxu0  ;;  %3948 = vmatpush1.bf16.msra.mxu1 %v3947_v29  ;;  %v5232_v29 = vld [vmem:[%s5983_s12] ss:$0 sm:$0xff] }
 0x37f   :  { %6060 = vst [vmem:[#allocation36_spill] sm:$0xff] %v5201_v8  ;;  %v5204_v6 = vpop.f32.mrb[73].mxu0  ;;  %3949 = vmatprep.subr.bf16.mxu1 %v6027_v63  ;;  %v3950_v63 = vpack.c.bf16 %v2666_v28, %v2665_v23  ;;  %v2650_v23 = vld [vmem:[%s5984_s13 + $0x98] sm:$0xff]  ;;  %v1088_v28 = vadd.f32 %v5232_v29, %v4962_v45  ;;  %v1098_v15 = vadd.f32 %v5232_v29, %v4974_v49 }
 0x380   :  { %6061 = vst [vmem:[#allocation37_spill] sm:$0xff] %v5204_v6  ;;  %v5214_v11 = vpop.f32.mrb[74].mxu0  ;;  %v1108_v49 = vadd.f32 %v5232_v29, %v4986_v0 }
 0x381   :  { %6063 = vst [vmem:[#allocation39_spill] sm:$0xff] %v5214_v11  ;;  %v5218_v60 = vpop.f32.mrb[75].mxu0 }
 0x382   :  { %6065 = vst [vmem:[#allocation41_spill] sm:$0xff] %v5218_v60  ;;  %v5223_v6 = vpop.f32.mrb[76].mxu0  ;;  %3951 = vmatpush1.bf16.msra.mxu1 %v3950_v63  ;;  %v2634_v63 = vld [vmem:[%s5984_s13 + $0x18] sm:$0xff] }
 0x383   :  { %6067 = vst [vmem:[#allocation43_spill] sm:$0xff] %v5223_v6  ;;  %v5227_v38 = vpop.f32.mrb[77].mxu0  ;;  %v2649_v6 = vld [vmem:[%s5984_s13 + $0x90] sm:$0xff] }
 0x384   :  { %6069 = vst [vmem:[#allocation45_spill] sm:$0xff] %v5227_v38 }
 0x3a2   :  { %v5212_v40 = vpop.f32.mrb[8].mxu1 }
 0x3a3   :  { %6062 = vst [vmem:[#allocation38_spill] sm:$0xff] %v5212_v40  ;;  %v5216_v17 = vpop.f32.mrb[9].mxu1 }
 0x3a4   :  { %6064 = vst [vmem:[#allocation40_spill] sm:$0xff] %v5216_v17  ;;  %v1093_v17 = vadd.f32 %v4959_v5, %v5232_v29  ;;  %v6074_v5 = vmov 0.0|0.0  }
 0x3a5   :  { %v5242_v40 = vpop.f32.mrb[78].mxu0  ;;  %3952 = vmatprep.subr.bf16.mxu1 %v6074_v5 }
 0x3a6   :  { %v5221_v33 = vpop.f32.mrb[10].mxu1  ;;  %6071 = vst [vmem:[#allocation47_spill] sm:$0xff] %v5242_v40  ;;  %v5248_v38 = vpop.f32.mrb[79].mxu0  ;;  %v1447_v11 = vmax.f32 %v1093_v17, 0.0  ;;  %v1113_v17 = vadd.f32 %v4983_v61, %v5232_v29 }
 0x3a7   :  { %6066 = vst [vmem:[#allocation42_spill] sm:$0xff] %v5221_v33  ;;  %v5225_v8 = vpop.f32.mrb[11].mxu1  ;;  %6073 = vst [vmem:[#allocation49_spill] sm:$0xff] %v5248_v38 }
 0x3a8   :  { %6068 = vst [vmem:[#allocation44_spill] sm:$0xff] %v5225_v8 }
 0x3a9   :  { %v5267_v60 = vpop.f32.mrb[80].mxu0 }
 0x3aa   :  { %v5240_v33 = vpop.f32.mrb[12].mxu1  ;;  %6076 = vst [vmem:[#allocation51_spill] sm:$0xff] %v5267_v60  ;;  %v5273_v45 = vpop.f32.mrb[81].mxu0  ;;  %v1123_v60 = vadd.f32 %v4995_v7, %v5232_v29  ;;  %v1128_v7 = vadd.f32 %v5232_v29, %v5010_v47  ;;  %v2652_v47 = vld [vmem:[%s5984_s13 + $0xa8] sm:$0xff] }
 0x3ab   :  { %6070 = vst [vmem:[#allocation46_spill] sm:$0xff] %v5240_v33  ;;  %v5244_v8 = vpop.f32.mrb[13].mxu1  ;;  %v3918_v33 = vpack.c.bf16 %v2650_v23, %v2649_v6  ;;  %v1103_v6 = vadd.f32 %v4971_v48, %v5232_v29  ;;  %6078 = vst [vmem:[#allocation53_spill] sm:$0xff] %v5273_v45  ;;  %v1446_v23 = vmax.f32 %v1088_v28, 0.0  ;;  %v1448_v48 = vmax.f32 %v1098_v15, 0.0 }
 0x3ac   :  { %6072 = vst [vmem:[#allocation48_spill] sm:$0xff] %v5244_v8  ;;  %v2633_v8 = vld [vmem:[%s5984_s13 + $0x10] sm:$0xff]  ;;  %v1450_v15 = vmax.f32 %v1108_v49, 0.0 }
 0x3ad   :  { %v3920_v38 = vpack.c.bf16 %v2634_v63, %v2633_v8  ;;  %3919 = vmatprep.subr.bf16.mxu0 %v3918_v33  ;;  %v1449_v8 = vmax.f32 %v1103_v6, 0.0 }
 0x3ae   :  { %v5265_v40 = vpop.f32.mrb[14].mxu1 }
 0x3af   :  { %6075 = vst [vmem:[#allocation50_spill] sm:$0xff] %v5265_v40  ;;  %v5269_v9 = vpop.f32.mrb[15].mxu1  ;;  %3921 = vmatpush3.bf16.msra.mxu0 %v3920_v38  ;;  %v2667_v40 = vld [vmem:[%s5984_s13 + $0x120] sm:$0xff]  ;;  %v2668_v38 = vld [vmem:[%s5984_s13 + $0x128] sm:$0xff] }
 0x3b0   :  { %6077 = vst [vmem:[#allocation52_spill] sm:$0xff] %v5269_v9  ;;  %v1451_v9 = vmax.f32 %v1113_v17, 0.0 }
 0x3b2   :  { %v3766_v21 = vpop.f32.mrb[16].mxu1 }
 0x3b3   :  { %v5277_v63 = vmul.f32 %v3766_v21, %v1447_v11  ;;  %v1873_v33 = vpop.f32.mrb[17].mxu1  ;;  %v3953_v21 = vpack.c.bf16 %v2668_v38, %v2667_v40  ;;  %v5291_v11 = vpop.f32.mrb[82].mxu0  ;;  %v1118_v40 = vadd.f32 %v5232_v29, %v4998_v13  ;;  %v1453_v38 = vmax.f32 %v1123_v60, 0.0  ;;  %v2670_v13 = vld [vmem:[%s5984_s13 + $0x138] sm:$0xff] }
 0x3b4   :  { %v5287_v28 = vmul.f32 %v1873_v33, %v1446_v23  ;;  %v5293_v6 = vpop.f32.mrb[83].mxu0  ;;  %v1133_v33 = vadd.f32 %v5007_v32, %v5232_v29 }
 0x3b5   :  { %6079 = vst [vmem:[#allocation54_spill] sm:$0xff] %v5277_v63  ;;  %3954 = vmatpush1.bf16.msra.mxu1 %v3953_v21  ;;  %v1452_v21 = vmax.f32 %v1118_v40, 0.0  ;;  %v5321_v32 = vpop.f32.mrb[84].mxu0  ;;  %v2636_v40 = vld [vmem:[%s5984_s13 + $0x28] sm:$0xff] }
 0x3b6   :  { %6080 = vst [vmem:[#allocation55_spill] sm:$0xff] %v5287_v28  ;;  %v3769_v61 = vpop.f32.mrb[18].mxu1  ;;  %3955 = vmatprep.subr.bf16.mxu1 %v6074_v5  ;;  %v1455_v60 = vmax.f32 %v1133_v33, 0.0  ;;  %v1143_v33 = vadd.f32 %v5019_v39, %v5232_v29  ;;  %v1153_v39 = vadd.f32 %v5031_v46, %v5232_v29 }
 0x3b7   :  { %v5295_v63 = vmul.f32 %v3769_v61, %v1449_v8  ;;  %v1883_v45 = vpop.f32.mrb[19].mxu1 }
 0x3b8   :  { %v5300_v23 = vmul.f32 %v1883_v45, %v1448_v48  ;;  %v2669_v45 = vld [vmem:[%s5984_s13 + $0x130] sm:$0xff] }
 0x3b9   :  { %6081 = vst [vmem:[#allocation56_spill] sm:$0xff] %v5295_v63  ;;  %v3956_v49 = vpack.c.bf16 %v2670_v13, %v2669_v45 }
 0x3ba   :  { %6082 = vst [vmem:[#allocation57_spill] sm:$0xff] %v5300_v23  ;;  %v3772_v0 = vpop.f32.mrb[20].mxu1  ;;  %v1138_v23 = vadd.f32 %v5232_v29, %v5022_v62  ;;  %v2672_v62 = vld [vmem:[%s5984_s13 + $0x148] sm:$0xff] }
 0x3bb   :  { %v5306_v17 = vmul.f32 %v3772_v0, %v1451_v9  ;;  %v1893_v8 = vpop.f32.mrb[21].mxu1  ;;  %v2651_v9 = vld [vmem:[%s5984_s13 + $0xa0] sm:$0xff]  ;;  %v5332_v0 = vpop.f32.mrb[85].mxu0  ;;  %3957 = vmatpush1.bf16.msra.mxu1 %v3956_v49 }
 0x3bc   :  { %v5308_v61 = vmul.f32 %v1893_v8, %v1450_v15  ;;  %v2635_v15 = vld [vmem:[%s5984_s13 + $0x20] sm:$0xff]  ;;  %v3922_v45 = vpack.c.bf16 %v2652_v47, %v2651_v9  ;;  %3958 = vmatprep.subr.bf16.mxu1 %v6074_v5  ;;  %v1148_v9 = vadd.f32 %v5232_v29, %v5034_v10  ;;  %v1158_v10 = vadd.f32 %v5232_v29, %v5046_v3  ;;  %v2653_v3 = vld [vmem:[%s5984_s13 + $0xb0] sm:$0xff] }
 0x3bd   :  { %6083 = vst [vmem:[#allocation58_spill] sm:$0xff] %v5306_v17  ;;  %v3924_v13 = vpack.c.bf16 %v2636_v40, %v2635_v15  ;;  %v1163_v40 = vadd.f32 %v5043_v2, %v5232_v29  ;;  %v1173_v2 = vadd.f32 %v5055_v35, %v5232_v29 }
 0x3be   :  { %6084 = vst [vmem:[#allocation59_spill] sm:$0xff] %v5308_v61  ;;  %v3775_v48 = vpop.f32.mrb[22].mxu1  ;;  %v1454_v61 = vmax.f32 %v1128_v7, 0.0  ;;  %3923 = vmatprep.subr.bf16.mxu0 %v3922_v45  ;;  %v1458_v45 = vmax.f32 %v1148_v9, 0.0  ;;  %v2673_v9 = vld [vmem:[%s5984_s13 + $0x150] sm:$0xff] }
 0x3bf   :  { %v5334_v8 = vmul.f32 %v3775_v48, %v1453_v38  ;;  %v1903_v17 = vpop.f32.mrb[23].mxu1  ;;  %3925 = vmatpush3.bf16.msra.mxu0 %v3924_v13  ;;  %v1457_v38 = vmax.f32 %v1143_v33, 0.0  ;;  %v5355_v33 = vpop.f32.mrb[86].mxu0 }
 0x3c0   :  { %v5338_v63 = vmul.f32 %v1903_v17, %v1452_v21  ;;  %v2671_v17 = vld [vmem:[%s5984_s13 + $0x140] sm:$0xff]  ;;  %v1456_v21 = vmax.f32 %v1138_v23, 0.0 }
 0x3c1   :  { %6085 = vst [vmem:[#allocation60_spill] sm:$0xff] %v5334_v8  ;;  %v3959_v49 = vpack.c.bf16 %v2672_v62, %v2671_v17  ;;  %v1460_v17 = vmax.f32 %v1158_v10, 0.0 }
 0x3c2   :  { %v3778_v28 = vpop.f32.mrb[24].mxu1 }
 0x3c3   :  { %v2241_v48 = vmul.f32 %v3778_v28, %v1455_v60  ;;  %v1913_v8 = vpop.f32.mrb[25].mxu1  ;;  %3960 = vmatpush1.bf16.msra.mxu1 %v3959_v49  ;;  %v1459_v60 = vmax.f32 %v1153_v39, 0.0 }
 0x3c4   :  { %v2240_v7 = vmul.f32 %v1913_v8, %v1454_v61  ;;  %3961 = vmatprep.subr.bf16.mxu1 %v6074_v5  ;;  %v5361_v61 = vpop.f32.mrb[87].mxu0 }
 0x3c6   :  { %v3781_v47 = vpop.f32.mrb[26].mxu1  ;;  %v4006_v28 = vpack.i.bf16 %v2241_v48, %v2240_v7  ;;  %v2654_v7 = vld [vmem:[%s5984_s13 + $0xb8] sm:$0xff] }
 0x3c7   :  { %v2243_v15 = vmul.f32 %v3781_v47, %v1457_v38  ;;  %v1923_v46 = vpop.f32.mrb[27].mxu1  ;;  %v1461_v38 = vmax.f32 %v1163_v40, 0.0  ;;  %v3926_v47 = vpack.c.bf16 %v2654_v7, %v2653_v3 }
 0x3c8   :  { %v2242_v23 = vmul.f32 %v1923_v46, %v1456_v21  ;;  %4007 = vrot.lane.b32.xlu1 %v4006_v28, %s4156_s28  ;;  %v1168_v21 = vadd.f32 %v5232_v29, %v5058_v36  ;;  %v2674_v28 = vld [vmem:[%s5984_s13 + $0x158] sm:$0xff]  ;;  %v1463_v36 = vmax.f32 %v1173_v2, 0.0  ;;  %v1183_v46 = vadd.f32 %v5067_v58, %v5232_v29 }
 0x3c9   :  { %v3962_v40 = vpack.c.bf16 %v2674_v28, %v2673_v9  ;;  %3927 = vmatprep.subr.bf16.mxu0 %v3926_v47  ;;  %v1203_v28 = vadd.f32 %v5091_v20, %v5232_v29 }
 0x3ca   :  { %v3784_v8 = vpop.f32.mrb[28].mxu1  ;;  %v4011_v13 = vpack.i.bf16 %v2243_v15, %v2242_v23  ;;  %v2638_v23 = vld [vmem:[%s5984_s13 + $0x38] sm:$0xff]  ;;  %v1462_v10 = vmax.f32 %v1168_v21, 0.0  ;;  %v1193_v21 = vadd.f32 %v5079_v31, %v5232_v29  ;;  %v2676_v31 = vld [vmem:[%s5984_s13 + $0x168] sm:$0xff] }
 0x3cb   :  { %v2245_v48 = vmul.f32 %v3784_v8, %v1459_v60  ;;  %v1933_v39 = vpop.f32.mrb[29].mxu1  ;;  %3963 = vmatpush1.bf16.msra.mxu1 %v3962_v40  ;;  %v1469_v20 = vmax.f32 %v1203_v28, 0.0  ;;  %v2657_v28 = vld [vmem:[%s5984_s13 + $0xd0] sm:$0xff] }
 0x3cc   :  { %v2244_v62 = vmul.f32 %v1933_v39, %v1458_v45  ;;  %4012 = vrot.lane.b32.xlu0 %v4011_v13, %s4156_s28  ;;  %v2637_v45 = vld [vmem:[%s5984_s13 + $0x30] sm:$0xff]  ;;  %v1178_v13 = vadd.f32 %v5232_v29, %v5070_v59  ;;  %3964 = vmatprep.subr.bf16.mxu1 %v6074_v5  ;;  %v1465_v39 = vmax.f32 %v1183_v46, 0.0  ;;  %v1188_v59 = vadd.f32 %v5232_v29, %v5082_v26 }
 0x3cd   :  { %v1198_v26 = vadd.f32 %v5232_v29, %v5094_v14  ;;  %v2655_v14 = vld [vmem:[%s5984_s13 + $0xc0] sm:$0xff] }
 0x3ce   :  { %v4016_v35 = vpack.i.bf16 %v2245_v48, %v2244_v62  ;;  %v3787_v49 = vpop.f32.mrb[30].mxu1 }
 0x3cf   :  { %v2247_v60 = vmul.f32 %v3787_v49, %v1461_v38  ;;  %v1943_v15 = vpop.f32.mrb[31].mxu1  ;;  %v3928_v38 = vpack.c.bf16 %v2638_v23, %v2637_v45 }
 0x3d0   :  { %v2246_v8 = vmul.f32 %v1943_v15, %v1460_v17  ;;  %4017 = vrot.lane.b32.xlu0 %v4016_v35, %s4156_s28  ;;  %v1464_v17 = vmax.f32 %v1178_v13, 0.0  ;;  %v1467_v35 = vmax.f32 %v1193_v21, 0.0  ;;  %v1468_v13 = vmax.f32 %v1198_v26, 0.0  ;;  %v2639_v21 = vld [vmem:[%s5984_s13 + $0x40] sm:$0xff]  ;;  %v2641_v26 = vld [vmem:[%s5984_s13 + $0x50] sm:$0xff] }
 0x3d1   :  { %3929 = vmatpush3.bf16.msra.mxu0 %v3928_v38 }
 0x3d2   :  { %v4021_v58 = vpack.i.bf16 %v2247_v60, %v2246_v8  ;;  %v3790_v48 = vpop.f32.mrb[32].mxu1  ;;  %v1466_v60 = vmax.f32 %v1188_v59, 0.0  ;;  %v1213_v8 = vadd.f32 %v5103_v43, %v5232_v29  ;;  %v1223_v43 = vadd.f32 %v5115_v37, %v5232_v29 }
 0x3d3   :  { %v2249_v2 = vmul.f32 %v3790_v48, %v1463_v36  ;;  %v1953_v62 = vpop.f32.mrb[33].mxu1  ;;  %v2675_v36 = vld [vmem:[%s5984_s13 + $0x160] sm:$0xff]  ;;  %v2656_v48 = vld [vmem:[%s5984_s13 + $0xc8] sm:$0xff]  ;;  %v1218_v37 = vadd.f32 %v5232_v29, %v5118_v24  ;;  %v2658_v24 = vld [vmem:[%s5984_s13 + $0xd8] sm:$0xff] }
 0x3d4   :  { %v2248_v3 = vmul.f32 %v1953_v62, %v1462_v10  ;;  %4022 = vrot.lane.b32.xlu0 %v4021_v58, %s4156_s28  ;;  %v3965_v46 = vpack.c.bf16 %v2676_v31, %v2675_v36  ;;  %v1208_v58 = vadd.f32 %v5232_v29, %v5106_v30  ;;  %v3930_v62 = vpack.c.bf16 %v2656_v48, %v2655_v14  ;;  %v2640_v30 = vld [vmem:[%s5984_s13 + $0x48] sm:$0xff]  ;;  %s4161_s28 = smov 68  }
 0x3d5   :  { %v1473_v31 = vmax.f32 %v1223_v43, 0.0  ;;  %v2660_v14 = vld [vmem:[%s5984_s13 + $0xe8] sm:$0xff] }
 0x3d6   :  { %v4026_v7 = vpack.i.bf16 %v2249_v2, %v2248_v3  ;;  %v3793_v9 = vpop.f32.mrb[34].mxu1  ;;  %3966 = vmatpush1.bf16.msra.mxu1 %v3965_v46  ;;  %3931 = vmatprep.subr.bf16.mxu0 %v3930_v62  ;;  %v2642_v46 = vld [vmem:[%s5984_s13 + $0x58] sm:$0xff] }
 0x3d7   :  { %v2251_v49 = vmul.f32 %v3793_v9, %v1465_v39  ;;  %v1963_v47 = vpop.f32.mrb[35].mxu1  ;;  %3967 = vmatprep.subr.bf16.mxu1 %v6074_v5  ;;  %v1470_v9 = vmax.f32 %v1208_v58, 0.0  ;;  %v2659_v58 = vld [vmem:[%s5984_s13 + $0xe0] sm:$0xff] }
 0x3d8   :  { %v2250_v15 = vmul.f32 %v1963_v47, %v1464_v17  ;;  %4027 = vrot.lane.b32.xlu0 %v4026_v7, %s4157_s21  ;;  %v1471_v17 = vmax.f32 %v1213_v8, 0.0  ;;  %v3932_v7 = vpack.c.bf16 %v2640_v30, %v2639_v21  ;;  %v2678_v47 = vld [vmem:[%s5984_s13 + $0x178] sm:$0xff]  ;;  %v1472_v8 = vmax.f32 %v1218_v37, 0.0 }
 0x3d9   :  { %v1243_v30 = vadd.f32 %v5136_v44, %v5232_v29 }
 0x3da   :  { %v4031_v40 = vpack.i.bf16 %v2251_v49, %v2250_v15  ;;  %v3796_v45 = vpop.f32.mrb[36].mxu1  ;;  %3933 = vmatpush3.bf16.msra.mxu0 %v3932_v7  ;;  %v2677_v49 = vld [vmem:[%s5984_s13 + $0x170] sm:$0xff]  ;;  %v1238_v7 = vadd.f32 %v5232_v29, %v5139_v4  ;;  %v2646_v4 = vld [vmem:[%s5984_s13 + $0x78] sm:$0xff] }
 0x3db   :  { %v2253_v23 = vmul.f32 %v3796_v45, %v1467_v35  ;;  %v1973_v10 = vpop.f32.mrb[37].mxu1  ;;  %v3968_v15 = vpack.c.bf16 %v2678_v47, %v2677_v49  ;;  %v2645_v47 = vld [vmem:[%s5984_s13 + $0x70] sm:$0xff] }
 0x3dc   :  { %v2252_v38 = vmul.f32 %v1973_v10, %v1466_v60  ;;  %4032 = vrot.lane.b32.xlu0 %v4031_v40, %s4157_s21  ;;  %v3936_v10 = vpack.c.bf16 %v2642_v46, %v2641_v26  ;;  %v3944_v26 = vpack.c.bf16 %v2646_v4, %v2645_v47  ;;  %v1476_v46 = vmax.f32 %v1238_v7, 0.0 }
 0x3dd   :  { %3969 = vmatpush1.bf16.msra.mxu1 %v3968_v15  ;;  %v2679_v15 = vld [vmem:[%s5984_s13 + $0x180] sm:$0xff] }
 0x3de   :  { %v4036_v39 = vpack.i.bf16 %v2253_v23, %v2252_v38  ;;  %v3799_v2 = vpop.f32.mrb[38].mxu1  ;;  %v3934_v23 = vpack.c.bf16 %v2658_v24, %v2657_v28  ;;  %v1228_v38 = vadd.f32 %v5232_v29, %v5130_v18  ;;  %3970 = vmatprep.subr.bf16.mxu1 %v6074_v5  ;;  %v2643_v18 = vld [vmem:[%s5984_s13 + $0x60] sm:$0xff]  ;;  %v1477_v28 = vmax.f32 %v1243_v30, 0.0  ;;  %v2680_v24 = vld [vmem:[%s5984_s13 + $0x188] sm:$0xff]  ;;  %v2681_v30 = vld [vmem:[%s5984_s13 + $0x190] sm:$0xff] }
 0x3df   :  { %v2255_v3 = vmul.f32 %v3799_v2, %v1469_v20  ;;  %v1983_v59 = vpop.f32.mrb[39].mxu1  ;;  %v1233_v20 = vadd.f32 %v5127_v25, %v5232_v29  ;;  %v2644_v2 = vld [vmem:[%s5984_s13 + $0x68] sm:$0xff] }
 0x3e0   :  { %v2254_v35 = vmul.f32 %v1983_v59, %v1468_v13  ;;  %4037 = vrot.lane.b32.xlu0 %v4036_v39, %s4157_s21  ;;  %3935 = vmatprep.subr.bf16.mxu0 %v3934_v23  ;;  %v3938_v39 = vpack.c.bf16 %v2660_v14, %v2659_v58 }
 0x3e1   :  { %3937 = vmatpush3.bf16.msra.mxu0 %v3936_v10  ;;  %v1475_v43 = vmax.f32 %v1233_v20, 0.0  ;;  %v3971_v20 = vpack.c.bf16 %v2680_v24, %v2679_v15  ;;  %v1288_v15 = vadd.f32 %v5232_v29, %v5159_v42  ;;  %v2684_v24 = vld [vmem:[%s5984_s13 + $0x1a8] sm:$0xff] }
 0x3e2   :  { %v4041_v36 = vpack.i.bf16 %v2255_v3, %v2254_v35  ;;  %v3802_v60 = vpop.f32.mrb[40].mxu1  ;;  %v1474_v3 = vmax.f32 %v1228_v38, 0.0  ;;  %3939 = vmatprep.subr.bf16.mxu0 %v3938_v39  ;;  %v2662_v35 = vld [vmem:[%s5984_s13 + $0xf8] sm:$0xff]  ;;  %v1263_v38 = vadd.f32 %v5145_v34, %v5232_v29  ;;  %v1268_v34 = vadd.f32 %v5232_v29, %v5151_v22 }
 0x3e3   :  { %v2257_v40 = vmul.f32 %v3802_v60, %v1471_v17  ;;  %v1993_v45 = vpop.f32.mrb[41].mxu1  ;;  %v3940_v17 = vpack.c.bf16 %v2644_v2, %v2643_v18  ;;  %v1253_v60 = vadd.f32 %v5141_v12, %v5232_v29  ;;  %3972 = vmatpush1.bf16.msra.mxu1 %v3971_v20 }
 0x3e4   :  { %v2256_v13 = vmul.f32 %v1993_v45, %v1470_v9  ;;  %4042 = vrot.lane.b32.xlu0 %v4041_v36, %s4157_s21  ;;  %v2661_v9 = vld [vmem:[%s5984_s13 + $0xf0] sm:$0xff]  ;;  %v1248_v45 = vadd.f32 %v5232_v29, %v5143_v41  ;;  %3973 = vmatprep.subr.bf16.mxu1 %v6074_v5  ;;  %v1258_v41 = vadd.f32 %v5232_v29, %v5147_v19  ;;  %v1481_v39 = vmax.f32 %v1263_v38, 0.0  ;;  %v2682_v19 = vld [vmem:[%s5984_s13 + $0x198] sm:$0xff] }
 0x3e5   :  { %3941 = vmatpush3.bf16.msra.mxu0 %v3940_v17  ;;  %v3942_v49 = vpack.c.bf16 %v2662_v35, %v2661_v9  ;;  %v1479_v10 = vmax.f32 %v1253_v60, 0.0  ;;  %v3974_v17 = vpack.c.bf16 %v2682_v19, %v2681_v30  ;;  %v1283_v35 = vadd.f32 %v5153_v1, %v5232_v29  ;;  %v2686_v30 = vld [vmem:[%s5984_s13 + $0x1b8] sm:$0xff] }
 0x3e6   :  { %v4046_v25 = vpack.i.bf16 %v2257_v40, %v2256_v13  ;;  %v3805_v48 = vpop.f32.mrb[42].mxu1  ;;  %v1478_v58 = vmax.f32 %v1248_v45, 0.0 }
 0x3e7   :  { %v2259_v62 = vmul.f32 %v3805_v48, %v1473_v31  ;;  %v2003_v21 = vpop.f32.mrb[43].mxu1  ;;  %3943 = vmatprep.subr.bf16.mxu0 %v3942_v49  ;;  %3975 = vmatpush1.bf16.msra.mxu1 %v3974_v17  ;;  %v1485_v4 = vmax.f32 %v1283_v35, 0.0  ;;  %v6086_v35 = vld [vmem:[#allocation29_spill] sm:$0xff] }
 0x3e8   :  { %v2258_v59 = vmul.f32 %v2003_v21, %v1472_v8  ;;  %4047 = vrot.lane.b32.xlu0 %v4046_v25, %s4158_s22  ;;  %3976 = vmatprep.subr.bf16.mxu1 %v6074_v5 }
 0x3e9   :  { %3945 = vmatpush3.bf16.msra.mxu0 %v3944_v26 }
 0x3ea   :  { %v4051_v37 = vpack.i.bf16 %v2259_v62, %v2258_v59  ;;  %v3808_v44 = vpop.f32.mrb[44].mxu1  ;;  %v1480_v62 = vmax.f32 %v1258_v41, 0.0  ;;  %v1313_v41 = vadd.f32 %v5165_v53, %v5232_v29  ;;  %v1318_v53 = vadd.f32 %v5232_v29, %v5171_v50 }
 0x3eb   :  { %v2261_v36 = vmul.f32 %v3808_v44, %v1475_v43  ;;  %v2013_v31 = vpop.f32.mrb[45].mxu1  ;;  %v1273_v43 = vadd.f32 %v5149_v16, %v5232_v29  ;;  %v1278_v44 = vadd.f32 %v5232_v29, %v5155_v57  ;;  %v2683_v57 = vld [vmem:[%s5984_s13 + $0x1a0] sm:$0xff] }
 0x3ec   :  { %v2260_v40 = vmul.f32 %v2013_v31, %v1474_v3  ;;  %4052 = vrot.lane.b32.xlu1 %v4051_v37, %s4158_s22  ;;  %v1482_v37 = vmax.f32 %v1268_v34, 0.0  ;;  %v1293_v31 = vadd.f32 %v5157_v56, %v5232_v29  ;;  %v3977_v26 = vpack.c.bf16 %v2684_v24, %v2683_v57 }
 0x3ed   :  { %v1483_v7 = vmax.f32 %v1273_v43, 0.0  ;;  %v1484_v1 = vmax.f32 %v1278_v44, 0.0 }
 0x3ee   :  { %v4056_v23 = vpack.i.bf16 %v2261_v36, %v2260_v40  ;;  %v3811_v12 = vpop.f32.mrb[46].mxu1  ;;  %v1487_v45 = vmax.f32 %v1293_v31, 0.0  ;;  %3978 = vmatpush1.bf16.msra.mxu1 %v3977_v26  ;;  %v2688_v31 = vld [vmem:[%s5984_s13 + $0x1c8] sm:$0xff] }
 0x3ef   :  { %v2263_v8 = vmul.f32 %v3811_v12, %v1477_v28  ;;  %v2023_v13 = vpop.f32.mrb[47].mxu1  ;;  %v1486_v12 = vmax.f32 %v1288_v15, 0.0  ;;  %3979 = vmatprep.subr.bf16.mxu1 %v6074_v5  ;;  %v6088_v15 = vld [vmem:[#allocation31_spill] sm:$0xff] }
 0x3f0   :  { %v2262_v14 = vmul.f32 %v2023_v13, %v1476_v46  ;;  %4057 = vrot.lane.b32.xlu1 %v4056_v23, %s4158_s22  ;;  %v1303_v23 = vadd.f32 %v5161_v55, %v5232_v29  ;;  %v1338_v57 = vadd.f32 %v5232_v29, %v6088_v15 }
 0x3f2   :  { %v4061_v25 = vpack.i.bf16 %v2263_v8, %v2262_v14  ;;  %v3814_v48 = vpop.f32.mrb[48].mxu1  ;;  %v1489_v38 = vmax.f32 %v1303_v23, 0.0 }
 0x3f3   :  { %v2265_v18 = vmul.f32 %v3814_v48, %v1479_v10  ;;  %v2033_v2 = vpop.f32.mrb[49].mxu1  ;;  %v1298_v10 = vadd.f32 %v5232_v29, %v5163_v54  ;;  %v1308_v48 = vadd.f32 %v5232_v29, %v5167_v52  ;;  %v1491_v54 = vmax.f32 %v1313_v41, 0.0  ;;  %v2685_v52 = vld [vmem:[%s5984_s13 + $0x1b0] sm:$0xff] }
 0x3f4   :  { %v2264_v21 = vmul.f32 %v2033_v2, %v1478_v58  ;;  %4062 = vrot.lane.b32.xlu1 %v4061_v25, %s4158_s22  ;;  %v3980_v19 = vpack.c.bf16 %v2686_v30, %v2685_v52  ;;  %v6093_v30 = vld [vmem:[#allocation36_spill] sm:$0xff] }
 0x3f5   :  { %v1488_v25 = vmax.f32 %v1298_v10, 0.0  ;;  %v6090_v10 = vld [vmem:[#allocation33_spill] sm:$0xff] }
 0x3f6   :  { %v4066_v3 = vpack.i.bf16 %v2265_v18, %v2264_v21  ;;  %v3817_v59 = vpop.f32.mrb[50].mxu1  ;;  %v1490_v21 = vmax.f32 %v1308_v48, 0.0  ;;  %3981 = vmatpush1.bf16.msra.mxu1 %v3980_v19  ;;  %v2689_v48 = vld [vmem:[%s5984_s13 + $0x1d0] sm:$0xff]  ;;  %v1373_v19 = vadd.f32 %v6093_v30, %v5232_v29 }
 0x3f7   :  { %v2267_v16 = vmul.f32 %v3817_v59, %v1481_v39  ;;  %v2043_v9 = vpop.f32.mrb[51].mxu1  ;;  %3982 = vmatprep.subr.bf16.mxu1 %v6074_v5 }
 0x3f8   :  { %v2266_v22 = vmul.f32 %v2043_v9, %v1480_v62  ;;  %4067 = vrot.lane.b32.xlu1 %v4066_v3, %s4159_s2  ;;  %v1323_v62 = vadd.f32 %v5169_v51, %v5232_v29  ;;  %v1492_v9 = vmax.f32 %v1318_v53, 0.0 }
 0x3fa   :  { %v4071_v49 = vpack.i.bf16 %v2267_v16, %v2266_v22  ;;  %v3820_v47 = vpop.f32.mrb[52].mxu1  ;;  %v1493_v51 = vmax.f32 %v1323_v62, 0.0  ;;  %v1333_v16 = vadd.f32 %v5173_v27, %v5232_v29  ;;  %v2687_v27 = vld [vmem:[%s5984_s13 + $0x1c0] sm:$0xff] }
 0x3fb   :  { %v2269_v28 = vmul.f32 %v3820_v47, %v1483_v7  ;;  %v2053_v36 = vpop.f32.mrb[53].mxu1  ;;  %v3983_v24 = vpack.c.bf16 %v2688_v31, %v2687_v27 }
 0x3fc   :  { %v2268_v60 = vmul.f32 %v2053_v36, %v1482_v37  ;;  %4072 = vrot.lane.b32.xlu1 %v4071_v49, %s4159_s2  ;;  %v1328_v37 = vadd.f32 %v5232_v29, %v6086_v35  ;;  %v1495_v49 = vmax.f32 %v1333_v16, 0.0 }
 0x3fd   :  { %3984 = vmatpush1.bf16.msra.mxu1 %v3983_v24 }
 0x3fe   :  { %v4076_v46 = vpack.i.bf16 %v2269_v28, %v2268_v60  ;;  %v3823_v40 = vpop.f32.mrb[54].mxu1  ;;  %v6087_v28 = vld [vmem:[#allocation30_spill] sm:$0xff]  ;;  %3985 = vmatprep.subr.bf16.mxu1 %v6074_v5  ;;  %v2690_v5 = vld [vmem:[%s5984_s13 + $0x1d8] sm:$0xff] }
 0x3ff   :  { %v2271_v56 = vmul.f32 %v3823_v40, %v1485_v4  ;;  %v2063_v20 = vpop.f32.mrb[55].mxu1  ;;  %v1343_v36 = vadd.f32 %v6087_v28, %v5232_v29 }
 0x400   :  { %v2270_v42 = vmul.f32 %v2063_v20, %v1484_v1  ;;  %4077 = vrot.lane.b32.xlu1 %v4076_v46, %s4159_s2  ;;  %v1494_v1 = vmax.f32 %v1328_v37, 0.0  ;;  %v6089_v20 = vld [vmem:[#allocation32_spill] sm:$0xff]  ;;  %v6095_v37 = vld [vmem:[#allocation39_spill] sm:$0xff] }
 0x401   :  { %v1497_v40 = vmax.f32 %v1343_v36, 0.0  ;;  %v1353_v23 = vadd.f32 %v6089_v20, %v5232_v29 }
 0x402   :  { %v4081_v8 = vpack.i.bf16 %v2271_v56, %v2270_v42  ;;  %v3826_v13 = vpop.f32.mrb[56].mxu1 }
 0x403   :  { %v2273_v58 = vmul.f32 %v3826_v13, %v1487_v45  ;;  %v2073_v14 = vpop.f32.mrb[57].mxu1 }
 0x404   :  { %v2272_v55 = vmul.f32 %v2073_v14, %v1486_v12  ;;  %4082 = vrot.lane.b32.xlu1 %v4081_v8, %s4159_s2  ;;  %v1496_v12 = vmax.f32 %v1338_v57, 0.0  ;;  %v1348_v8 = vadd.f32 %v5232_v29, %v6090_v10  ;;  %v6097_v57 = vld [vmem:[#allocation43_spill] sm:$0xff]  ;;  %s4168_s2 = smov 24  }
 0x405   :  { %v1393_v24 = vadd.f32 %v6097_v57, %v5232_v29 }
 0x406   :  { %v4086_v39 = vpack.i.bf16 %v2273_v58, %v2272_v55  ;;  %v3829_v18 = vpop.f32.mrb[58].mxu1  ;;  %v1499_v58 = vmax.f32 %v1353_v23, 0.0  ;;  %v4162_v23 = vmov 0.0  }
 0x407   :  { %v2275_v2 = vmul.f32 %v3829_v18, %v1489_v38  ;;  %v2083_v43 = vpop.f32.mrb[59].mxu1 }
 0x408   :  { %v2274_v34 = vmul.f32 %v2083_v43, %v1488_v25  ;;  %4087 = vrot.lane.b32.xlu0 %v4086_v39, %s4160_s19  ;;  %v6091_v25 = vld [vmem:[#allocation34_spill] sm:$0xff]  ;;  %v1498_v39 = vmax.f32 %v1348_v8, 0.0  ;;  %v3986_v43 = vpack.c.bf16 %v2690_v5, %v2689_v48 }
 0x409   :  { %v1363_v55 = vadd.f32 %v6091_v25, %v5232_v29 }
 0x40a   :  { %v4091_v17 = vpack.i.bf16 %v2275_v2, %v2274_v34  ;;  %v3832_v3 = vpop.f32.mrb[60].mxu1  ;;  %3987 = vmatpush1.bf16.msra.mxu1 %v3986_v43 }
 0x40b   :  { %v2277_v59 = vmul.f32 %v3832_v3, %v1491_v54  ;;  %v2093_v7 = vpop.f32.mrb[61].mxu1  ;;  %v6092_v54 = vld [vmem:[#allocation35_spill] sm:$0xff]  ;;  %v1501_v34 = vmax.f32 %v1363_v55, 0.0  ;;  %2888 = vmatprep.subr.mxu1 %v4162_v23 }
 0x40c   :  { %v2276_v50 = vmul.f32 %v2093_v7, %v1490_v21  ;;  %4092 = vrot.lane.b32.xlu0 %v4091_v17, %s4160_s19  ;;  %v1358_v2 = vadd.f32 %v5232_v29, %v6092_v54 }
 0x40e   :  { %v4096_v22 = vpack.i.bf16 %v2277_v59, %v2276_v50  ;;  %v3835_v44 = vpop.f32.mrb[62].mxu1  ;;  %v1500_v17 = vmax.f32 %v1358_v2, 0.0 }
 0x40f   :  { %v5557_v47 = vmul.f32 %v3835_v44, %v1493_v51  ;;  %v2103_v4 = vpop.f32.mrb[63].mxu1  ;;  %v6094_v51 = vld [vmem:[#allocation37_spill] sm:$0xff] }
 0x410   :  { %v5567_v60 = vmul.f32 %v2103_v4, %v1492_v9  ;;  %4097 = vrot.lane.b32.xlu0 %v4096_v22, %s4160_s19  ;;  %v1368_v59 = vadd.f32 %v5232_v29, %v6094_v51  ;;  %v1503_v9 = vmax.f32 %v1373_v19, 0.0  ;;  %v1383_v22 = vadd.f32 %v6095_v37, %v5232_v29  ;;  %v6096_v4 = vld [vmem:[#allocation41_spill] sm:$0xff] }
 0x411   :  { %v1378_v28 = vadd.f32 %v5232_v29, %v6096_v4  ;;  %v1423_v19 = vadd.f32 %v5291_v11, %v5232_v29  ;;  %v1418_v51 = vadd.f32 %v5232_v29, %v5293_v6 }
 0x412   :  { %v4116_v26 = vpack.i.bf16 %v5557_v47, %v5567_v60  ;;  %v3838_v46 = vpop.f32.mrb[64].mxu1  ;;  %v1502_v44 = vmax.f32 %v1368_v59, 0.0  ;;  %v1505_v31 = vmax.f32 %v1383_v22, 0.0  ;;  %v6103_v60 = vld [vmem:[#allocation22_spill] sm:$0xff] }
 0x413   :  { %v2281_v45 = vmul.f32 %v3838_v46, %v1495_v49  ;;  %v2113_v56 = vpop.f32.mrb[65].mxu1  ;;  %v2691_v46 = vld [vmem:[%s5984_s13 + $0x1e0] sm:$0x3f]  ;;  %v1512_v22 = vmax.f32 %v1418_v51, 0.0  ;;  %s4164_s13 = smov 48  }
 0x414   :  { %v2280_v42 = vmul.f32 %v2113_v56, %v1494_v1  ;;  %v6098_v56 = vld [vmem:[#allocation45_spill] sm:$0xff]  ;;  %3295 = vmatpush1.msk.msra.mxu1 %vm454_vm11, %v2691_v46 }
 0x415   :  { %v1388_v20 = vadd.f32 %v5232_v29, %v6098_v56 }
 0x416   :  { %v4101_v13 = vpack.i.bf16 %v2281_v45, %v2280_v42  ;;  %v3841_v38 = vpop.f32.mrb[66].mxu1  ;;  %v1507_v42 = vmax.f32 %v1393_v24, 0.0 }
 0x417   :  { %v2283_v14 = vmul.f32 %v3841_v38, %v1497_v40  ;;  %v2123_v41 = vpop.f32.mrb[67].mxu1  ;;  %v1504_v40 = vmax.f32 %v1378_v28, 0.0 }
 0x418   :  { %v2282_v18 = vmul.f32 %v2123_v41, %v1496_v12  ;;  %4102 = vrot.lane.b32.xlu1 %v4101_v13, %s4161_s28  ;;  %v6099_v13 = vld [vmem:[#allocation47_spill] sm:$0xff]  ;;  %v6100_v41 = vld [vmem:[#allocation49_spill] sm:$0xff] }
 0x419   :  { %v1403_v38 = vadd.f32 %v6099_v13, %v5232_v29  ;;  %v1398_v25 = vadd.f32 %v5232_v29, %v6100_v41  ;;  %v6111_v41 = vld [vmem:[#allocation14_spill] sm:$0xff] }
 0x41a   :  { %v4106_v62 = vpack.i.bf16 %v2283_v14, %v2282_v18  ;;  %v3844_v21 = vpop.f32.mrb[68].mxu1  ;;  %v6101_v18 = vld [vmem:[#allocation51_spill] sm:$0xff] }
 0x41b   :  { %v2285_v53 = vmul.f32 %v3844_v21, %v1499_v58  ;;  %v2133_v52 = vpop.f32.mrb[69].mxu1  ;;  %v1506_v58 = vmax.f32 %v1388_v20, 0.0  ;;  %v1509_v48 = vmax.f32 %v1403_v38, 0.0  ;;  %v1413_v54 = vadd.f32 %v6101_v18, %v5232_v29  ;;  %v6109_v38 = vld [vmem:[#allocation28_spill] sm:$0xff] }
 0x41c   :  { %v2284_v3 = vmul.f32 %v2133_v52, %v1498_v39  ;;  %4107 = vrot.lane.b32.xlu1 %v4106_v62, %s4161_s28  ;;  %v1508_v2 = vmax.f32 %v1398_v25, 0.0  ;;  %v6102_v62 = vld [vmem:[#allocation53_spill] sm:$0xff]  ;;  %v6112_v25 = vmax.f32 %v6111_v41, 0.0 }
 0x41d   :  { %v1408_v21 = vadd.f32 %v5232_v29, %v6102_v62  ;;  %v6121_v62 = vld [vmem:[#allocation25_spill] sm:$0xff] }
 0x41e   :  { %v4111_v7 = vpack.i.bf16 %v2285_v53, %v2284_v3  ;;  %v3847_v16 = vpop.f32.mrb[70].mxu1  ;;  %v1511_v53 = vmax.f32 %v1413_v54, 0.0 }
 0x41f   :  { %v5595_v50 = vmul.f32 %v3847_v16, %v1501_v34  ;;  %v2143_v35 = vpop.f32.mrb[71].mxu1 }
 0x420   :  { %v5599_v49 = vmul.f32 %v2143_v35, %v1500_v17  ;;  %4112 = vrot.lane.b32.xlu1 %v4111_v7, %s4161_s28  ;;  %v1510_v17 = vmax.f32 %v1408_v21, 0.0  ;;  %v1433_v35 = vadd.f32 %v5321_v32, %v5232_v29  ;;  %v1438_v32 = vadd.f32 %v5232_v29, %v5361_v61 }
 0x421   :  { %v6122_v21 = vmax.f32 %v6121_v62, 0.0 }
 0x422   :  { %v4121_v36 = vpack.i.bf16 %v5595_v50, %v5599_v49  ;;  %v3850_v27 = vpop.f32.mrb[72].mxu1  ;;  %v1515_v28 = vmax.f32 %v1433_v35, 0.0  ;;  %v6113_v50 = vld [vmem:[#allocation21_spill] sm:$0xff] }
 0x423   :  { %v2289_v1 = vmul.f32 %v3850_v27, %v1503_v9  ;;  %v2153_v15 = vpop.f32.mrb[73].mxu1  ;;  %v1513_v9 = vmax.f32 %v1423_v19, 0.0  ;;  %v1443_v27 = vadd.f32 %v5355_v33, %v5232_v29  ;;  %v6114_v49 = vmax.f32 %v6113_v50, 0.0  ;;  %v6125_v19 = vld [vmem:[#allocation27_spill] sm:$0xff] }
 0x424   :  { %v2288_v45 = vmul.f32 %v2153_v15, %v1502_v44  ;;  %v1428_v44 = vadd.f32 %v5232_v29, %v5332_v0 }
 0x425   :  { %2506 = vrot.lane.b32.xlu0 %v2289_v1, %s4163_s30  ;;  %v1517_v24 = vmax.f32 %v1443_v27, 0.0 }
 0x426   :  { %v3853_v12 = vpop.f32.mrb[74].mxu1  ;;  %v1514_v1 = vmax.f32 %v1428_v44, 0.0 }
 0x427   :  { %v2291_v10 = vmul.f32 %v3853_v12, %v1505_v31  ;;  %v2163_v8 = vpop.f32.mrb[75].mxu1  ;;  %v6105_v12 = vld [vmem:[#allocation24_spill] sm:$0xff] }
 0x428   :  { %v2290_v14 = vmul.f32 %v2163_v8, %v1504_v40  ;;  %v1516_v40 = vmax.f32 %v1438_v32, 0.0 }
 0x429   :  { %2504 = vrot.lane.b32.xlu0 %v2288_v45, %s4163_s30 }
 0x42a   :  { %v3856_v55 = vpop.f32.mrb[76].mxu1 }
 0x42b   :  { %v2293_v5 = vmul.f32 %v3856_v55, %v1507_v42  ;;  %v2173_v39 = vpop.f32.mrb[77].mxu1  ;;  %v6106_v42 = vmax.f32 %v6105_v12, 0.0  ;;  %v6115_v55 = vld [vmem:[#allocation16_spill] sm:$0xff] }
 0x42c   :  { %v2292_v43 = vmul.f32 %v2173_v39, %v1506_v58  ;;  %v6110_v58 = vmax.f32 %v6109_v38, 0.0 }
 0x42d   :  { %2510 = vrot.lane.b32.xlu0 %v2291_v10, %s4163_s30  ;;  %v6107_v10 = vld [vmem:[#allocation26_spill] sm:$0xff] }
 0x42e   :  { %v3859_v34 = vpop.f32.mrb[78].mxu1  ;;  %v6108_v8 = vmax.f32 %v6107_v10, 0.0 }
 0x42f   :  { %v2295_v52 = vmul.f32 %v3859_v34, %v1509_v48  ;;  %v2183_v30 = vpop.f32.mrb[79].mxu1  ;;  %v6116_v48 = vmax.f32 %v6115_v55, 0.0 }
 0x430   :  { %v2294_v3 = vmul.f32 %v2183_v30, %v1508_v2  ;;  %v6119_v2 = vld [vmem:[#allocation18_spill] sm:$0xff] }
 0x431   :  { %2508 = vrot.lane.b32.xlu0 %v2290_v14, %s4163_s30 }
 0x432   :  { %v3862_v59 = vpop.f32.mrb[80].mxu1 }
 0x433   :  { %v2297_v7 = vmul.f32 %v3862_v59, %v1511_v53  ;;  %v2193_v16 = vpop.f32.mrb[81].mxu1 }
 0x434   :  { %v2296_v37 = vmul.f32 %v2193_v16, %v1510_v17  ;;  %v6126_v17 = vmax.f32 %v6125_v19, 0.0 }
 0x435   :  { %2514 = vrot.lane.b32.xlu0 %v2293_v5, %s4163_s30  ;;  %2538 = vrot.lane.b32.xlu1 %v2297_v7, %s4164_s13  ;;  %v6117_v5 = vld [vmem:[#allocation23_spill] sm:$0xff]  ;;  %v6127_v7 = vld [vmem:[#allocation13_spill] sm:$0xff] }
 0x436   :  { %v3865_v11 = vpop.f32.mrb[82].mxu1  ;;  %v6118_v39 = vmax.f32 %v6117_v5, 0.0  ;;  %v6128_v16 = vmax.f32 %v6127_v7, 0.0 }
 0x437   :  { %v2299_v6 = vmul.f32 %v3865_v11, %v1513_v9  ;;  %v2203_v4 = vpop.f32.mrb[83].mxu1 }
 0x438   :  { %v2298_v31 = vmul.f32 %v2203_v4, %v1512_v22 }
 0x439   :  { %2512 = vrot.lane.b32.xlu0 %v2292_v43, %s4163_s30  ;;  %2536 = vrot.lane.b32.xlu1 %v2296_v37, %s4164_s13  ;;  %v6120_v43 = vmax.f32 %v6119_v2, 0.0  ;;  %v6138_v2 = vld [vmem:[#allocation56_spill] sm:$0xff] }
 0x43a   :  { %v3868_v0 = vpop.f32.mrb[84].mxu1 }
 0x43b   :  { %v2301_v15 = vmul.f32 %v3868_v0, %v1515_v28  ;;  %v2213_v57 = vpop.f32.mrb[85].mxu1  ;;  %v6129_v28 = vld [vmem:[#allocation55_spill] sm:$0xff] }
 0x43c   :  { %v2300_v46 = vmul.f32 %v2213_v57, %v1514_v1 }
 0x43d   :  { %4117 = vrot.lane.b32.xlu0 %v4116_v26, %s4160_s19  ;;  %2542 = vrot.lane.b32.xlu1 %v2299_v6, %s4164_s13  ;;  %v6104_v26 = vmax.f32 %v6103_v60, 0.0  ;;  %v6134_v60 = vld [vmem:[#allocation54_spill] sm:$0xff] }
 0x43e   :  { %v5647_v33 = vpop.permute.xlu0 %4012  ;;  %v3871_v29 = vpop.f32.mrb[86].mxu1 }
 0x43f   :  { %v2303_v61 = vmul.f32 %v3871_v29, %v1517_v24  ;;  %v2223_v45 = vpop.f32.mrb[87].mxu1  ;;  %v4015_v41 = vunpack.i.h.bf16 %v5647_v33 }
 0x440   :  { %v2302_v56 = vmul.f32 %v2223_v45, %v1516_v40  ;;  %v6132_v45 = vld [vmem:[#allocation17_spill] sm:$0xff] }
 0x441   :  { %2516 = vrot.lane.b32.xlu0 %v2294_v3, %s4163_s30  ;;  %2540 = vrot.lane.b32.xlu1 %v2298_v31, %s4164_s13  ;;  %v6130_v31 = vld [vmem:[#allocation15_spill] sm:$0xff] }
 0x442   :  { %v5651_v20 = vpop.permute.xlu0 %4017  ;;  %v6131_v1 = vmax.f32 %v6130_v31, 0.0 }
 0x445   :  { %2518 = vrot.lane.b32.xlu0 %v2295_v52, %s4163_s30  ;;  %2546 = vrot.lane.b32.xlu1 %v2301_v15, %s4164_s13  ;;  %v6123_v52 = vld [vmem:[#allocation20_spill] sm:$0xff] }
 0x446   :  { %v5655_v47 = vpop.permute.xlu0 %4022  ;;  %v6124_v30 = vmax.f32 %v6123_v52, 0.0 }
 0x449   :  { %2945 = vrot.lane.b32.xlu0 %v6104_v26, %s4165_s6  ;;  %2544 = vrot.lane.b32.xlu1 %v2300_v46, %s4164_s13 }
 0x44a   :  { %v4028_v23 = vpop.permute.xlu0 %4027 }
 0x44b   :  { %v4029_v9 = vunpack.i.l.bf16 %v4028_v23  ;;  %v4030_v11 = vunpack.i.h.bf16 %v4028_v23 }
 0x44d   :  { %2949 = vrot.lane.b32.xlu0 %v6106_v42, %s4165_s6  ;;  %4122 = vrot.lane.b32.xlu1 %v4121_v36, %s4161_s28  ;;  %v4008_v36 = vpop.permute.xlu1 %4007 }
 0x44e   :  { %v5669_v13 = vpop.permute.xlu0 %4032  ;;  %v4009_v59 = vunpack.i.l.bf16 %v4008_v36  ;;  %v4010_v4 = vunpack.i.h.bf16 %v4008_v36 }
 0x44f   :  { %v4034_v29 = vunpack.i.l.bf16 %v5669_v13  ;;  %v4035_v38 = vunpack.i.h.bf16 %v5669_v13 }
 0x450   :  { %v2560_v27 = vsel %vm429_vm12, %v6129_v28, %v4009_v59  ;;  %v2561_v26 = vsel %vm429_vm12, %v6134_v60, %v4010_v4  ;;  %v6139_v59 = vld [vmem:[#allocation59_spill] sm:$0xff] }
 0x451   :  { %2953 = vrot.lane.b32.xlu0 %v6108_v8, %s4165_s6  ;;  %2548 = vrot.lane.b32.xlu1 %v2302_v56, %s4164_s13  ;;  %v2569_v57 = vsel %vm2568_vm1, %v2560_v27, %v4029_v9  ;;  %v6133_v56 = vmax.f32 %v6132_v45, 0.0  ;;  %v2570_v12 = vsel %vm2568_vm1, %v2561_v26, %v4030_v11  ;;  %v6141_v45 = vld [vmem:[#allocation60_spill] sm:$0xff] }
 0x452   :  { %v5674_v14 = vpop.permute.xlu0 %4037 }
 0x453   :  { %v4040_v19 = vunpack.i.h.bf16 %v5674_v14 }
 0x455   :  { %2957 = vrot.lane.b32.xlu0 %v6110_v58, %s4165_s6  ;;  %2550 = vrot.lane.b32.xlu1 %v2303_v61, %s4164_s13  ;;  %v4014_v61 = vunpack.i.l.bf16 %v5647_v33 }
 0x456   :  { %v5686_v54 = vpop.permute.xlu0 %4042 }
 0x459   :  { %3001 = vrot.lane.b32.xlu0 %v6112_v25, %s4166_s7  ;;  %2947 = vrot.lane.b32.xlu1 %v6114_v49, %s4165_s6  ;;  %v6135_v25 = vld [vmem:[#allocation19_spill] sm:$0xff]  ;;  %v6137_v49 = vld [vmem:[#allocation57_spill] sm:$0xff] }
 0x45a   :  { %v4048_v53 = vpop.permute.xlu0 %4047  ;;  %v6136_v50 = vmax.f32 %v6135_v25, 0.0  ;;  %v2562_v36 = vsel %vm429_vm12, %v6137_v49, %v4014_v61 }
 0x45b   :  { %v4049_v51 = vunpack.i.l.bf16 %v4048_v53  ;;  %v4050_v35 = vunpack.i.h.bf16 %v4048_v53 }
 0x45d   :  { %3005 = vrot.lane.b32.xlu0 %v6116_v48, %s4166_s7  ;;  %2951 = vrot.lane.b32.xlu1 %v6118_v39, %s4165_s6  ;;  %v2578_v6 = vsel %vm2577_vm15, %v4029_v9, %v4049_v51  ;;  %v2579_v24 = vsel %vm2577_vm15, %v4030_v11, %v4050_v35  ;;  %v2571_v48 = vsel %vm2568_vm1, %v2562_v36, %v4034_v29  ;;  %v4039_v39 = vunpack.i.l.bf16 %v5674_v14 }
 0x45e   :  { %v4053_v18 = vpop.permute.xlu1 %4052  ;;  %v4020_v51 = vunpack.i.h.bf16 %v5651_v20  ;;  %v4044_v11 = vunpack.i.l.bf16 %v5686_v54 }
 0x45f   :  { %v4054_v0 = vunpack.i.l.bf16 %v4053_v18  ;;  %v4055_v23 = vunpack.i.h.bf16 %v4053_v18  ;;  %v4019_v18 = vunpack.i.l.bf16 %v5651_v20  ;;  %v4024_v20 = vunpack.i.l.bf16 %v5655_v47 }
 0x461   :  { %3009 = vrot.lane.b32.xlu0 %v6120_v43, %s4166_s7  ;;  %2955 = vrot.lane.b32.xlu1 %v6122_v21, %s4165_s6  ;;  %v2580_v42 = vsel %vm2577_vm15, %v4034_v29, %v4054_v0  ;;  %v2581_v5 = vsel %vm2577_vm15, %v4035_v38, %v4055_v23  ;;  %v2563_v43 = vsel %vm429_vm12, %v6138_v2, %v4015_v41  ;;  %v4045_v0 = vunpack.i.h.bf16 %v5686_v54 }
 0x462   :  { %v5693_v34 = vpop.permute.xlu1 %4057  ;;  %v2572_v21 = vsel %vm2568_vm1, %v2563_v43, %v4035_v38 }
 0x463   :  { %v4059_v55 = vunpack.i.l.bf16 %v5693_v34  ;;  %v4060_v62 = vunpack.i.h.bf16 %v5693_v34  ;;  %v2564_v34 = vsel %vm429_vm12, %v6139_v59, %v4019_v18 }
 0x465   :  { %3013 = vrot.lane.b32.xlu0 %v6124_v30, %s4166_s7  ;;  %2959 = vrot.lane.b32.xlu1 %v6126_v17, %s4165_s6  ;;  %v2582_v53 = vsel %vm2577_vm15, %v4039_v39, %v4059_v55  ;;  %v2583_v9 = vsel %vm2577_vm15, %v4040_v19, %v4060_v62 }
 0x466   :  { %v5700_v3 = vpop.permute.xlu1 %4062 }
 0x467   :  { %v4064_v7 = vunpack.i.l.bf16 %v5700_v3  ;;  %v4065_v28 = vunpack.i.h.bf16 %v5700_v3 }
 0x469   :  { %3003 = vrot.lane.b32.xlu1 %v6128_v16, %s4166_s7  ;;  %v2573_v16 = vsel %vm2568_vm1, %v2564_v34, %v4039_v39  ;;  %v2584_v31 = vsel %vm2577_vm15, %v4044_v11, %v4064_v7 }
 0x46a   :  { %v5705_v37 = vpop.permute.xlu1 %4067 }
 0x46b   :  { %v4070_v22 = vunpack.i.h.bf16 %v5705_v37  ;;  %v4069_v44 = vunpack.i.l.bf16 %v5705_v37 }
 0x46d   :  { %3007 = vrot.lane.b32.xlu1 %v6131_v1, %s4166_s7  ;;  %v2587_v32 = vsel %vm2586_vm0, %v2578_v6, %v4069_v44  ;;  %v2588_v40 = vsel %vm2586_vm0, %v2579_v24, %v4070_v22  ;;  %v6140_v6 = vld [vmem:[#allocation58_spill] sm:$0xff]  ;;  %v2566_v24 = vsel %vm429_vm12, %v5338_v63, %v4024_v20 }
 0x46e   :  { %2791 = vmatprep.mubr.f32.mxu0 %v2587_v32  ;;  %v5718_v15 = vpop.permute.xlu1 %4072  ;;  %v2565_v4 = vsel %vm429_vm12, %v6140_v6, %v4020_v51  ;;  %v2575_v3 = vsel %vm2568_vm1, %v2566_v24, %v4044_v11 }
 0x46f   :  { %v4074_v46 = vunpack.i.l.bf16 %v5718_v15  ;;  %2792 = vmatmul.mubr.f32.vlgmr.msra.gmra.mrb[88].mxu0 %v2569_v57  ;;  %v4075_v10 = vunpack.i.h.bf16 %v5718_v15  ;;  %v2574_v27 = vsel %vm2568_vm1, %v2565_v4, %v4040_v19  ;;  %v4025_v57 = vunpack.i.h.bf16 %v5655_v47 }
 0x470   :  { %2796 = vmatprep.mubr.f32.mxu0 %v2588_v40  ;;  %v2585_v40 = vsel %vm2577_vm15, %v4045_v0, %v4065_v28 }
 0x471   :  { %3011 = vrot.lane.b32.xlu1 %v6133_v56, %s4166_s7  ;;  %v2589_v8 = vsel %vm2586_vm0, %v2580_v42, %v4074_v46  ;;  %v2590_v33 = vsel %vm2586_vm0, %v2581_v5, %v4075_v10  ;;  %v2567_v54 = vsel %vm429_vm12, %v6141_v45, %v4025_v57 }
 0x472   :  { %v5740_v58 = vpop.permute.xlu1 %4077  ;;  %v2576_v56 = vsel %vm2568_vm1, %v2567_v54, %v4045_v0 }
 0x473   :  { %2797 = vmatmul.mubr.f32.gmra.mrb[90].mxu0 %v2570_v12  ;;  %v4079_v13 = vunpack.i.l.bf16 %v5740_v58  ;;  %v4080_v52 = vunpack.i.h.bf16 %v5740_v58 }
 0x474   :  { %2801 = vmatprep.mubr.f32.mxu0 %v2589_v8 }
 0x475   :  { %3015 = vrot.lane.b32.xlu1 %v6136_v50, %s4166_s7  ;;  %v2591_v30 = vsel %vm2586_vm0, %v2582_v53, %v4079_v13  ;;  %v2592_v14 = vsel %vm2586_vm0, %v2583_v9, %v4080_v52 }
 0x476   :  { %v5767_v17 = vpop.permute.xlu1 %4082 }
 0x477   :  { %2802 = vmatmul.mubr.f32.gmra.mrb[92].mxu0 %v2571_v48  ;;  %v4084_v35 = vunpack.i.l.bf16 %v5767_v17  ;;  %v4085_v1 = vunpack.i.h.bf16 %v5767_v17  ;;  %v6143_v17 = vld [vmem:[#allocation6_spill] sm:$0xff] }
 0x478   :  { %2806 = vmatprep.mubr.f32.mxu0 %v2590_v33 }
 0x479   :  { %v2593_v32 = vsel %vm2586_vm0, %v2584_v31, %v4084_v35  ;;  %v2594_v61 = vsel %vm2586_vm0, %v2585_v40, %v4085_v1  ;;  %3027 = vrot.lane.b32.xlu1 %v6143_v17, %s4167_s9 }
 0x47a   :  { %v4088_v29 = vpop.permute.xlu0 %4087 }
 0x47b   :  { %2807 = vmatmul.mubr.f32.gmra.mrb[94].mxu0 %v2572_v21  ;;  %v4089_v38 = vunpack.i.l.bf16 %v4088_v29  ;;  %v4090_v49 = vunpack.i.h.bf16 %v4088_v29 }
 0x47c   :  { %2811 = vmatprep.mubr.f32.mxu0 %v2591_v30 }
 0x47d   :  { %v2596_v36 = vsel %vm2595_vm2, %v4069_v44, %v4089_v38  ;;  %v2597_v62 = vsel %vm2595_vm2, %v4070_v22, %v4090_v49  ;;  %v6147_v49 = vld [vmem:[#allocation10_spill] sm:$0xff] }
 0x47e   :  { %v4093_v47 = vpop.permute.xlu0 %4092 }
 0x47f   :  { %2812 = vmatmul.mubr.f32.gmra.mrb[96].mxu0 %v2573_v16  ;;  %v4094_v43 = vunpack.i.l.bf16 %v4093_v47  ;;  %v4095_v19 = vunpack.i.h.bf16 %v4093_v47 }
 0x480   :  { %2816 = vmatprep.mubr.f32.mxu0 %v2592_v14 }
 0x481   :  { %v2598_v59 = vsel %vm2595_vm2, %v4074_v46, %v4094_v43  ;;  %v2599_v46 = vsel %vm2595_vm2, %v4075_v10, %v4095_v19 }
 0x482   :  { %v5802_v60 = vpop.permute.xlu0 %4097 }
 0x483   :  { %2817 = vmatmul.mubr.f32.gmra.mrb[98].mxu0 %v2574_v27  ;;  %v4099_v14 = vunpack.i.l.bf16 %v5802_v60  ;;  %v4100_v27 = vunpack.i.h.bf16 %v5802_v60 }
 0x484   :  { %2821 = vmatprep.mubr.f32.mxu0 %v2593_v32 }
 0x485   :  { %v2600_v32 = vsel %vm2595_vm2, %v4079_v13, %v4099_v14  ;;  %v2601_v13 = vsel %vm2595_vm2, %v4080_v52, %v4100_v27 }
 0x487   :  { %2822 = vmatmul.mubr.f32.gmra.mrb[100].mxu0 %v2575_v3 }
 0x488   :  { %2826 = vmatprep.mubr.f32.mxu0 %v2594_v61 }
 0x48a   :  { %v4103_v63 = vpop.permute.xlu1 %4102 }
 0x48b   :  { %2827 = vmatmul.mubr.f32.gmra.mrb[102].mxu0 %v2576_v56  ;;  %v4104_v25 = vunpack.i.l.bf16 %v4103_v63  ;;  %v4105_v48 = vunpack.i.h.bf16 %v4103_v63 }
 0x48d   :  { %v2605_v5 = vsel %vm2604_vm3, %v2596_v36, %v4104_v25  ;;  %v2606_v53 = vsel %vm2604_vm3, %v2597_v62, %v4105_v48  ;;  %v6145_v25 = vld [vmem:[#allocation8_spill] sm:$0xff] }
 0x48e   :  { %v4108_v12 = vpop.permute.xlu1 %4107  ;;  %3031 = vrot.lane.b32.xlu1 %v6145_v25, %s4167_s9 }
 0x48f   :  { %v4109_v21 = vunpack.i.l.bf16 %v4108_v12  ;;  %v4110_v34 = vunpack.i.h.bf16 %v4108_v12 }
 0x491   :  { %v2607_v37 = vsel %vm2604_vm3, %v2598_v59, %v4109_v21  ;;  %v2608_v6 = vsel %vm2604_vm3, %v2599_v46, %v4110_v34 }
 0x492   :  { %v5804_v8 = vpop.permute.xlu1 %4112  ;;  %3035 = vrot.lane.b32.xlu1 %v6147_v49, %s4167_s9 }
 0x493   :  { %v4114_v20 = vunpack.i.l.bf16 %v5804_v8  ;;  %v4115_v0 = vunpack.i.h.bf16 %v5804_v8 }
 0x495   :  { %v2609_v10 = vsel %vm2604_vm3, %v2600_v32, %v4114_v20  ;;  %v2610_v61 = vsel %vm2604_vm3, %v2601_v13, %v4115_v0 }
 0x497   :  { %v2507_v26 = vpop.permute.xlu0 %2506 }
 0x498   :  { %v2615_v30 = vsel %vm2613_vm6, %v2606_v53, %v2507_v26 }
 0x49b   :  { %v2505_v23 = vpop.permute.xlu0 %2504 }
 0x49c   :  { %v2614_v39 = vsel %vm2613_vm6, %v2605_v5, %v2505_v23 }
 0x49f   :  { %v2511_v42 = vpop.permute.xlu0 %2510 }
 0x4a0   :  { %v2617_v4 = vsel %vm2613_vm6, %v2608_v6, %v2511_v42 }
 0x4a3   :  { %v2509_v50 = vpop.permute.xlu0 %2508 }
 0x4a4   :  { %v2616_v22 = vsel %vm2613_vm6, %v2607_v37, %v2509_v50 }
 0x4a7   :  { %v2539_v41 = vpop.permute.xlu1 %2538  ;;  %v2515_v18 = vpop.permute.xlu0 %2514 }
 0x4a8   :  { %v2624_v2 = vsel %vm2622_vm5, %v2507_v26, %v2539_v41  ;;  %v2619_v56 = vsel %vm2613_vm6, %v2610_v61, %v2515_v18  ;;  %v6142_v41 = vld [vmem:[#allocation5_spill] sm:$0xff] }
 0x4a9   :  { %3025 = vrot.lane.b32.xlu0 %v6142_v41, %s4167_s9 }
 0x4ab   :  { %v2537_v55 = vpop.permute.xlu1 %2536  ;;  %v2513_v7 = vpop.permute.xlu0 %2512 }
 0x4ac   :  { %v2623_v33 = vsel %vm2622_vm5, %v2505_v23, %v2537_v55  ;;  %v2618_v24 = vsel %vm2613_vm6, %v2609_v10, %v2513_v7 }
 0x4ad   :  { %3296 = vmatprep.mubr.msk.f32.mxu1 %vm2699_vm4, %v2623_v33 }
 0x4ae   :  { %2897 = vmatmul.mubr.f32.vlgmr.msra.gmra.mrb[88].mxu1 %v2614_v39 }
 0x4af   :  { %3297 = vmatprep.mubr.msk.f32.mxu1 %vm2699_vm4, %v2624_v2  ;;  %v2543_v44 = vpop.permute.xlu1 %2542  ;;  %v4118_v28 = vpop.permute.xlu0 %4117 }
 0x4b0   :  { %v2626_v9 = vsel %vm2622_vm5, %v2511_v42, %v2543_v44  ;;  %v4119_v57 = vunpack.i.l.bf16 %v4118_v28  ;;  %v4120_v45 = vunpack.i.h.bf16 %v4118_v28 }
 0x4b2   :  { %2902 = vmatmul.mubr.f32.gmra.mrb[90].mxu1 %v2615_v30  ;;  %v2602_v47 = vsel %vm2595_vm2, %v4084_v35, %v4119_v57  ;;  %v2603_v23 = vsel %vm2595_vm2, %v4085_v1, %v4120_v45  ;;  %v6144_v1 = vld [vmem:[#allocation7_spill] sm:$0xff] }
 0x4b3   :  { %v2541_v51 = vpop.permute.xlu1 %2540  ;;  %v2517_v54 = vpop.permute.xlu0 %2516  ;;  %3029 = vrot.lane.b32.xlu0 %v6144_v1, %s4167_s9 }
 0x4b4   :  { %v2625_v16 = vsel %vm2622_vm5, %v2509_v50, %v2541_v51  ;;  %v6146_v50 = vld [vmem:[#allocation9_spill] sm:$0xff] }
 0x4b5   :  { %3298 = vmatprep.mubr.msk.f32.mxu1 %vm2699_vm4, %v2625_v16 }
 0x4b6   :  { %2907 = vmatmul.mubr.f32.gmra.mrb[92].mxu1 %v2616_v22 }
 0x4b7   :  { %3299 = vmatprep.mubr.msk.f32.mxu1 %vm2699_vm4, %v2626_v9  ;;  %v2547_v11 = vpop.permute.xlu1 %2546  ;;  %v2519_v42 = vpop.permute.xlu0 %2518  ;;  %3033 = vrot.lane.b32.xlu0 %v6146_v50, %s4167_s9 }
 0x4b8   :  { %v2628_v3 = vsel %vm2622_vm5, %v2515_v18, %v2547_v11  ;;  %v3294_v11 = vld [vmem:[%s5985_s14] ss:$0 sm:$0xff] }
 0x4ba   :  { %2912 = vmatmul.mubr.f32.gmra.mrb[94].mxu1 %v2617_v4 }
 0x4bb   :  { %v2545_v31 = vpop.permute.xlu1 %2544 }
 0x4bc   :  { %v2627_v15 = vsel %vm2622_vm5, %v2513_v7, %v2545_v31 }
 0x4bd   :  { %3300 = vmatprep.mubr.msk.f32.mxu1 %vm2699_vm4, %v2627_v15 }
 0x4be   :  { %2917 = vmatmul.mubr.f32.gmra.mrb[96].mxu1 %v2618_v24 }
 0x4bf   :  { %3301 = vmatprep.mubr.msk.f32.mxu1 %vm2699_vm4, %v2628_v3  ;;  %v4123_v40 = vpop.permute.xlu1 %4122 }
 0x4c0   :  { %v4124_v29 = vunpack.i.l.bf16 %v4123_v40  ;;  %v4125_v60 = vunpack.i.h.bf16 %v4123_v40 }
 0x4c2   :  { %2922 = vmatmul.mubr.f32.gmra.mrb[98].mxu1 %v2619_v56  ;;  %v2611_v63 = vsel %vm2604_vm3, %v2602_v47, %v4124_v29  ;;  %v2612_v12 = vsel %vm2604_vm3, %v2603_v23, %v4125_v60 }
 0x4c3   :  { %v2549_v26 = vpop.permute.xlu1 %2548  ;;  %v2620_v52 = vsel %vm2613_vm6, %v2611_v63, %v2517_v54  ;;  %v2621_v38 = vsel %vm2613_vm6, %v2612_v12, %v2519_v42 }
 0x4c4   :  { %v2629_v58 = vsel %vm2622_vm5, %v2517_v54, %v2549_v26 }
 0x4c5   :  { %3302 = vmatprep.mubr.msk.f32.mxu1 %vm2699_vm4, %v2629_v58 }
 0x4c6   :  { %2927 = vmatmul.mubr.f32.gmra.mrb[100].mxu1 %v2620_v52 }
 0x4c7   :  { %v2551_v35 = vpop.permute.xlu1 %2550 }
 0x4c8   :  { %v2630_v8 = vsel %vm2622_vm5, %v2519_v42, %v2551_v35 }
 0x4c9   :  { %3303 = vmatprep.mubr.msk.f32.mxu1 %vm2699_vm4, %v2630_v8 }
 0x4ca   :  { %2932 = vmatmul.mubr.f32.gmra.mrb[102].mxu1 %v2621_v38 }
 0x542   :  { %v3536_v36 = vpop.f32.mrb[88].mxu0 }
 0x543   :  { %v3537_v55 = vpop.f32.mrb[89].mxu0 }
 0x544   :  { %v3538_v48 = vadd.f32 %v3537_v55, %v3536_v36  ;;  %v6148_v55 = vld [vmem:[#allocation11_spill] sm:$0xff] }
 0x546   :  { %v3539_v5 = vpop.f32.mrb[90].mxu0  ;;  %v2794_v46 = vadd.f32 %v3538_v48, %v3294_v11  ;;  %v6149_v48 = vld [vmem:[#allocation12_spill] sm:$0xff] }
 0x547   :  { %v3540_v33 = vpop.f32.mrb[91].mxu0 }
 0x548   :  { %v3541_v39 = vadd.f32 %v3540_v33, %v3539_v5  ;;  %v2946_v5 = vpop.permute.xlu0 %2945  ;;  %v2948_v33 = vpop.permute.xlu1 %2947 }
 0x54a   :  { %v3542_v18 = vpop.f32.mrb[92].mxu0  ;;  %v2799_v27 = vadd.f32 %v3541_v39, %v3294_v11 }
 0x54b   :  { %v3543_v2 = vpop.f32.mrb[93].mxu0 }
 0x54c   :  { %v3544_v43 = vadd.f32 %v3543_v2, %v3542_v18  ;;  %v2950_v39 = vpop.permute.xlu0 %2949  ;;  %v2952_v18 = vpop.permute.xlu1 %2951 }
 0x54e   :  { %v3545_v44 = vpop.f32.mrb[94].mxu0  ;;  %v2804_v10 = vadd.f32 %v3544_v43, %v3294_v11 }
 0x54f   :  { %v3546_v62 = vpop.f32.mrb[95].mxu0 }
 0x550   :  { %v3547_v21 = vadd.f32 %v3546_v62, %v3545_v44  ;;  %v2954_v2 = vpop.permute.xlu0 %2953  ;;  %v5893_v43 = vpop.permute.xlu1 %2955 }
 0x552   :  { %v3548_v53 = vpop.f32.mrb[96].mxu0  ;;  %v2809_v13 = vadd.f32 %v3547_v21, %v3294_v11 }
 0x553   :  { %v3549_v30 = vpop.f32.mrb[97].mxu0 }
 0x554   :  { %v3550_v19 = vadd.f32 %v3549_v30, %v3548_v53  ;;  %v5895_v44 = vpop.permute.xlu0 %2957  ;;  %v5897_v62 = vpop.permute.xlu1 %2959 }
 0x556   :  { %v3551_v51 = vpop.f32.mrb[98].mxu0  ;;  %v2814_v56 = vadd.f32 %v3550_v19, %v3294_v11 }
 0x557   :  { %v3552_v59 = vpop.f32.mrb[99].mxu0 }
 0x558   :  { %v3553_v34 = vadd.f32 %v3552_v59, %v3551_v51  ;;  %v3002_v21 = vpop.permute.xlu0 %3001  ;;  %v3004_v53 = vpop.permute.xlu1 %3003 }
 0x55a   :  { %v3554_v7 = vpop.f32.mrb[100].mxu0  ;;  %v2819_v58 = vadd.f32 %v3553_v34, %v3294_v11 }
 0x55b   :  { %v3555_v16 = vpop.f32.mrb[101].mxu0 }
 0x55c   :  { %v3556_v37 = vadd.f32 %v3555_v16, %v3554_v7  ;;  %v3006_v30 = vpop.permute.xlu0 %3005  ;;  %v3008_v19 = vpop.permute.xlu1 %3007 }
 0x55e   :  { %v3557_v22 = vpop.f32.mrb[102].mxu0  ;;  %v2824_v35 = vadd.f32 %v3556_v37, %v3294_v11 }
 0x55f   :  { %v3558_v9 = vpop.f32.mrb[103].mxu0 }
 0x560   :  { %v3559_v14 = vadd.f32 %v3558_v9, %v3557_v22  ;;  %v3010_v51 = vpop.permute.xlu0 %3009  ;;  %v3012_v59 = vpop.permute.xlu1 %3011  ;;  %v3138_v9 = vld [vmem:[%s5981_s10] ss:$0 sm:$0xff]  ;;  %s4169_s10 = smov [#allocation2]  }
 0x561   :  { %s3097_s8 = sshll.u32 %s4169_s10, 4  ;;  %s3098_s8 = int_to_ptr.vmem [resolvable:$true] %s3097_s8 }
 0x562   :  { %v2829_v1 = vadd.f32 %v3559_v14, %v3294_v11  ;;  %v6150_v11 = vld [vmem:[#allocation40_spill] sm:$0xff]  ;;  %s4130_s5 = scalar_lea.vmem %s3098_s8, 1024  ;;  %p4135_p1 = scmp.lt.s32.totalorder %s3098_s8, %s3098_s8 }
 0x563   :  { %p4131_p0 = scmp.ne.s32.totalorder %s3098_s8, %s4130_s5  ;;  %p4136_p2 = scmp.lt.s32.totalorder %s4130_s5, %s4130_s5 }
 0x564   :  { %v5899_v34 = vpop.permute.xlu0 %3013  ;;  %v5901_v7 = vpop.permute.xlu1 %3015 }
 0x565   :  { %p4137_p3 = por %p4136_p2, %p4135_p1 }
 0x567   :  { %p4138_p4 = pnand %p4137_p3, %p4131_p0 }
 0x568   :  { %v3026_v16 = vpop.permute.xlu0 %3025  ;;  %v3028_v37 = vpop.permute.xlu1 %3027 }
 0x56c   :  { %v3030_v22 = vpop.permute.xlu0 %3029  ;;  %v3032_v14 = vpop.permute.xlu1 %3031 }
 0x581   :  { %v2898_v20 = vpop.f32.mrb[88].mxu1 }
 0x582   :  { %v2899_v6 = vadd.f32 %v2898_v20, %v2794_v46  ;;  %v2900_v4 = vpop.f32.mrb[89].mxu1  ;;  %v675_v46 = vadd.f32 %v3138_v9, %v6150_v11  ;;  %v3034_v20 = vpop.permute.xlu0 %3033 }
 0x584   :  { %v2937_v28 = vmax.f32 %v2899_v6, 0.0  ;;  %v6151_v6 = vld [vmem:[#allocation38_spill] sm:$0xff] }
 0x585   :  { %v2903_v31 = vpop.f32.mrb[90].mxu1  ;;  %v680_v4 = vadd.f32 %v6151_v6, %v3138_v9 }
 0x586   :  { %v2904_v32 = vadd.f32 %v2903_v31, %v2799_v27  ;;  %v2905_v0 = vpop.f32.mrb[91].mxu1  ;;  %2977 = vrot.lane.b32.xlu0 %v2937_v28, %s4168_s2  ;;  %v713_v28 = vmax.f32 %v675_v46, 0.0  ;;  %v3036_v27 = vpop.permute.xlu1 %3035 }
 0x588   :  { %v2938_v15 = vmax.f32 %v2904_v32, 0.0  ;;  %v3049_v31 = vsel %vm801_vm13, %v713_v28, %v2946_v5  ;;  %v6156_v5 = vld [vmem:[#allocation52_spill] sm:$0xff] }
 0x589   :  { %v2908_v57 = vpop.f32.mrb[92].mxu1 }
 0x58a   :  { %v2909_v24 = vadd.f32 %v2908_v57, %v2804_v10  ;;  %v2910_v3 = vpop.f32.mrb[93].mxu1  ;;  %2979 = vrot.lane.b32.xlu1 %v2938_v15, %s4168_s2  ;;  %v714_v15 = vmax.f32 %v680_v4, 0.0  ;;  %v6152_v10 = vld [vmem:[#allocation44_spill] sm:$0xff] }
 0x58b   :  { %v685_v57 = vadd.f32 %v3138_v9, %v6152_v10 }
 0x58c   :  { %v2939_v40 = vmax.f32 %v2909_v24, 0.0 }
 0x58d   :  { %v2913_v29 = vpop.f32.mrb[94].mxu1 }
 0x58e   :  { %v2914_v61 = vadd.f32 %v2913_v29, %v2809_v13  ;;  %v2915_v45 = vpop.f32.mrb[95].mxu1  ;;  %2981 = vrot.lane.b32.xlu0 %v2939_v40, %s4168_s2  ;;  %v3050_v40 = vsel %vm801_vm13, %v714_v15, %v2948_v33  ;;  %v705_v33 = vadd.f32 %v3138_v9, %v6156_v5 }
 0x590   :  { %v2940_v54 = vmax.f32 %v2914_v61, 0.0  ;;  %v6153_v61 = vld [vmem:[#allocation42_spill] sm:$0xff] }
 0x591   :  { %v2918_v47 = vpop.f32.mrb[96].mxu1  ;;  %v690_v45 = vadd.f32 %v6153_v61, %v3138_v9 }
 0x592   :  { %v2919_v60 = vadd.f32 %v2918_v47, %v2814_v56  ;;  %v2920_v63 = vpop.f32.mrb[97].mxu1  ;;  %2983 = vrot.lane.b32.xlu1 %v2940_v54, %s4168_s2  ;;  %v715_v54 = vmax.f32 %v685_v57, 0.0 }
 0x594   :  { %v2941_v26 = vmax.f32 %v2919_v60, 0.0  ;;  %v3051_v60 = vsel %vm801_vm13, %v715_v54, %v2950_v39 }
 0x595   :  { %v2923_v52 = vpop.f32.mrb[98].mxu1 }
 0x596   :  { %v2924_v23 = vadd.f32 %v2923_v52, %v2819_v58  ;;  %v2925_v12 = vpop.f32.mrb[99].mxu1  ;;  %2985 = vrot.lane.b32.xlu0 %v2941_v26, %s4168_s2  ;;  %v716_v58 = vmax.f32 %v690_v45, 0.0  ;;  %v6154_v52 = vld [vmem:[#allocation48_spill] sm:$0xff] }
 0x598   :  { %v2942_v42 = vmax.f32 %v2924_v23, 0.0  ;;  %v695_v23 = vadd.f32 %v3138_v9, %v6154_v52 }
 0x599   :  { %v2928_v8 = vpop.f32.mrb[100].mxu1 }
 0x59a   :  { %v2929_v38 = vadd.f32 %v2928_v8, %v2824_v35  ;;  %2987 = vrot.lane.b32.xlu1 %v2942_v42, %s4168_s2  ;;  %v2930_v41 = vpop.f32.mrb[101].mxu1  ;;  %v3052_v35 = vsel %vm801_vm13, %v716_v58, %v2952_v18 }
 0x59b   :  { %v6155_v41 = vld [vmem:[#allocation46_spill] sm:$0xff] }
 0x59c   :  { %v2943_v17 = vmax.f32 %v2929_v38, 0.0 }
 0x59d   :  { %v2933_v25 = vpop.f32.mrb[102].mxu1 }
 0x59e   :  { %v2934_v50 = vadd.f32 %v2933_v25, %v2829_v1  ;;  %2989 = vrot.lane.b32.xlu0 %v2943_v17, %s4168_s2  ;;  %v2935_v49 = vpop.f32.mrb[103].mxu1  ;;  %v700_v17 = vadd.f32 %v6155_v41, %v3138_v9  ;;  %v717_v1 = vmax.f32 %v695_v23, 0.0 }
 0x5a0   :  { %v2944_v36 = vmax.f32 %v2934_v50, 0.0  ;;  %v3053_v49 = vsel %vm801_vm13, %v717_v1, %v2954_v2 }
 0x5a2   :  { %3037 = vrot.lane.b32.xlu0 %v6148_v55, %s4167_s9  ;;  %2991 = vrot.lane.b32.xlu1 %v2944_v36, %s4168_s2 }
 0x5a6   :  { %3039 = vrot.lane.b32.xlu1 %v6149_v48, %s4167_s9  ;;  %v718_v48 = vmax.f32 %v700_v17, 0.0 }
 0x5f8   :  { %v2978_v32 = vpop.permute.xlu0 %2977 }
 0x5f9   :  { %v3058_v0 = vsel %vm3057_vm7, %v3049_v31, %v2978_v32 }
 0x5fa   :  { %v3067_v24 = vsel %vm3066_vm8, %v3058_v0, %v3002_v21  ;;  %v3054_v21 = vsel %vm801_vm13, %v718_v48, %v5893_v43 }
 0x5fb   :  { %v3076_v3 = vsel %vm3075_vm9, %v3067_v24, %v3026_v16  ;;  %v719_v16 = vmax.f32 %v705_v33, 0.0 }
 0x5fc   :  { %3084 = vst.msk [vmem:[#allocation2] sm:$0xff] %vm2699_vm4, %v3076_v3  ;;  %v2980_v13 = vpop.permute.xlu1 %2979 }
 0x5fd   :  { %v3059_v29 = vsel %vm3057_vm7, %v3050_v40, %v2980_v13 }
 0x5fe   :  { %v3068_v56 = vsel %vm3066_vm8, %v3059_v29, %v3004_v53 }
 0x5ff   :  { %v3077_v47 = vsel %vm3075_vm9, %v3068_v56, %v3028_v37 }
 0x600   :  { %3085 = vst.msk [vmem:[#allocation2 + $0x8] sm:$0xff] %vm2699_vm4, %v3077_v47  ;;  %v2982_v63 = vpop.permute.xlu0 %2981 }
 0x601   :  { %v3060_v26 = vsel %vm3057_vm7, %v3051_v60, %v2982_v63 }
 0x602   :  { %v3069_v12 = vsel %vm3066_vm8, %v3060_v26, %v3006_v30  ;;  %v6157_v30 = vld [vmem:[#allocation50_spill] sm:$0xff] }
 0x603   :  { %v3078_v42 = vsel %vm3075_vm9, %v3069_v12, %v3030_v22 }
 0x604   :  { %3086 = vst.msk [vmem:[#allocation2 + $0x10] sm:$0xff] %vm2699_vm4, %v3078_v42  ;;  %v2984_v8 = vpop.permute.xlu1 %2983 }
 0x605   :  { %v3061_v38 = vsel %vm3057_vm7, %v3052_v35, %v2984_v8 }
 0x606   :  { %v3070_v25 = vsel %vm3066_vm8, %v3061_v38, %v3008_v19  ;;  %v710_v19 = vadd.f32 %v6157_v30, %v3138_v9 }
 0x607   :  { %v3079_v50 = vsel %vm3075_vm9, %v3070_v25, %v3032_v14 }
 0x608   :  { %3087 = vst.msk [vmem:[#allocation2 + $0x18] sm:$0xff] %vm2699_vm4, %v3079_v50  ;;  %v2986_v36 = vpop.permute.xlu0 %2985  ;;  %v720_v11 = vmax.f32 %v710_v19, 0.0 }
 0x609   :  { %v3062_v55 = vsel %vm3057_vm7, %v3053_v49, %v2986_v36 }
 0x60a   :  { %v3071_v39 = vsel %vm3066_vm8, %v3062_v55, %v3010_v51  ;;  %v3055_v51 = vsel %vm801_vm13, %v719_v16, %v5895_v44  ;;  %v3056_v46 = vsel %vm801_vm13, %v720_v11, %v5897_v62 }
 0x60b   :  { %v3080_v18 = vsel %vm3075_vm9, %v3071_v39, %v3034_v20 }
 0x60c   :  { %3088 = vst.msk [vmem:[#allocation2 + $0x20] sm:$0xff] %vm2699_vm4, %v3080_v18  ;;  %v2988_v53 = vpop.permute.xlu1 %2987 }
 0x60d   :  { %v3063_v2 = vsel %vm3057_vm7, %v3054_v21, %v2988_v53 }
 0x60e   :  { %v3072_v37 = vsel %vm3066_vm8, %v3063_v2, %v3012_v59 }
 0x60f   :  { %v3081_v22 = vsel %vm3075_vm9, %v3072_v37, %v3036_v27 }
 0x610   :  { %3089 = vst.msk [vmem:[#allocation2 + $0x28] sm:$0xff] %vm2699_vm4, %v3081_v22  ;;  %v2990_v14 = vpop.permute.xlu0 %2989 }
 0x611   :  { %v3064_v43 = vsel %vm3057_vm7, %v3055_v51, %v2990_v14 }
 0x612   :  { %v3073_v9 = vsel %vm3066_vm8, %v3064_v43, %v5899_v34 }
 0x614   :  { %v3038_v20 = vpop.permute.xlu0 %3037  ;;  %v2992_v6 = vpop.permute.xlu1 %2991 }
 0x615   :  { %v3082_v59 = vsel %vm3075_vm9, %v3073_v9, %v3038_v20  ;;  %v3065_v4 = vsel %vm3057_vm7, %v3056_v46, %v2992_v6 }
 0x616   :  { %3090 = vst.msk [vmem:[#allocation2 + $0x30] sm:$0xff] %vm2699_vm4, %v3082_v59  ;;  %v3074_v44 = vsel %vm3066_vm8, %v3065_v4, %v5901_v7 }
 0x618   :  { %v3040_v28 = vpop.permute.xlu1 %3039 }
 0x619   :  { %v3083_v62 = vsel %vm3075_vm9, %v3074_v44, %v3040_v28 }
 0x61a   :  { %3091 = vst.msk [vmem:[#allocation2 + $0x38] sm:$0xff] %vm2699_vm4, %v3083_v62 }
 0x61b   :  { %4141 = shalt.err (!%p4138_p4)
}
 0x61c   :  { %s4142_s11 = scalar_lea.hbm %s5986_s15, 1024 }
 0x61d   :  { %p4143_p5 = scmp.ne.s32.totalorder %s5986_s15, %s4142_s11  ;;  %p4146_p6 = scmp.lt.u32.totalorder %s4142_s11, %s5986_s15 }
 0x61f   :  { %p4148_p7 = pnand %p4146_p6, %p4143_p5 }
 0x621   :  { %4151 = shalt.err (!%p4148_p7)
}
 0x622   :  { %s4170_s4 = smov 128   ;;  %s4171_s23 = smov 8  }
 0x623   :  { %3103 = dma.vmem_to_hbm [thread:$0]  %s3098_s8, 1024, %s5986_s15, [#allocation3], %s4170_s4, %s4170_s4, %s4171_s23  }
 0x624   :  { %4152 = dma.done.wait [#allocation3], 1024  }
 0x625   :  { %4153 = vsyncadd [#allocation3], 4294966272 }
 0x626   :  { %3107 = vsyncpa [#allocation3], 1 }

</bundles_post_ra>
